<compile_context>
chip_gen: v7x
topology: tpu7x:2x2x1
jax: 0.10.0
libtpu: 0.0.40
codegen_flags: <defaults>
</compile_context>

<pallas_src>
import functools
from collections import namedtuple
from types import SimpleNamespace

import jax
import jax.numpy as jnp
from jax.experimental import pallas as pl
from jax.experimental.pallas import tpu as pltpu


def _round_up(x, m):
    return (x + m - 1) // m * m


def _softmax(x, axis):
    m = jnp.max(x, axis=axis, keepdims=True)
    e = jnp.exp(x - m)
    return e * pl.reciprocal(jnp.sum(e, axis=axis, keepdims=True), approx=True)


# ----------------------------------------------------------------------------
# Local (region-word) similarity kernel.
# Grid: (image blocks [outer, "parallel"], captions [inner, "arbitrary"]).
# Per step: attention of caption i's words over image block j, weighted context,
# cosine similarity, and the per-caption log-sum-exp similarity row, written as
# a disjoint (1, bi, 1) block of the (captions x images) matrix.
# ----------------------------------------------------------------------------
def local_sim_kernel(lens_ref, words_ref, wnorm_ref, ctx_ref, sim_ref,
                     *, temp_attention, temp_similarity, cos_eps, t_valid):
    i = pl.program_id(1)                       # caption index (inner grid axis)
    BI, Tp, Dp = ctx_ref.shape
    Lp = words_ref.shape[2]
    NEG = jnp.float32(-1e30)

    cap_len = lens_ref[i]                      # valid words of caption i

    words = words_ref[0]                       # (Dp, Lp) bf16
    ctx = ctx_ref[...]                         # (BI, Tp, Dp) bf16

    # masks for padded words (lane axis) and padded spatial positions (sublanes)
    lmask = jax.lax.broadcasted_iota(jnp.int32, (1, 1, Lp), 2) < cap_len
    tmask = jax.lax.broadcasted_iota(jnp.int32, (1, Tp, 1), 1) < t_valid

    # attention scores: one MXU matmul for the whole image block, f32 accumulate
    scores = jnp.dot(ctx.reshape(BI * Tp, Dp), words,
                     preferred_element_type=jnp.float32).reshape(BI, Tp, Lp)

    # softmax over words (lane axis)
    attn_query = _softmax(jnp.where(lmask, scores, NEG), axis=-1)       # (BI,Tp,Lp)

    # softmax over spatial positions (axis=1) — no transpose needed
    z = jnp.where(tmask, attn_query * jnp.float32(temp_attention), NEG)
    attn_ctx = _softmax(z, axis=1)                                      # (BI,Tp,Lp)

    # weighted context per word: (BI, Lp, Dp), f32 accumulation on the MXU
    weighted = jnp.einsum('btl,btd->bld', attn_ctx.astype(jnp.bfloat16), ctx,
                          preferred_element_type=jnp.float32)

    # cosine similarity.  dotp via the identity
    #   <weighted[b,l,:], words[:,l]> = sum_t attn_ctx[b,t,l] * scores[b,t,l]
    # (both already live; sublane reduce over Tp instead of a Dp-wide pass).
    dotp = jnp.sum(attn_ctx * scores, axis=1)                           # (BI, Lp)
    c_norm = jnp.sqrt(jnp.sum(weighted * weighted, axis=-1))            # (BI, Lp)
    w_norm = wnorm_ref[0]                                               # (1,  Lp)
    denom = jnp.maximum(w_norm, jnp.float32(cos_eps)) * \
            jnp.maximum(c_norm, jnp.float32(cos_eps))
    cos = dotp / denom                                                  # exact div

    sim_word = jnp.exp(cos * jnp.float32(temp_similarity))              # (BI, Lp)
    lmask2 = jax.lax.broadcasted_iota(jnp.int32, (1, Lp), 1) < cap_len
    cap_sim = jnp.log(jnp.sum(jnp.where(lmask2, sim_word, 0.0),
                              axis=-1, keepdims=True))                  # (BI, 1)

    sim_ref[...] = cap_sim[None]                                        # (1, BI, 1)


# ----------------------------------------------------------------------------
# Diagonal attention-map kernel: attention of caption i's words over image i.
# Stored untransposed (Tp on sublanes, Lp=128k on lanes -> lane-dense stores).
# ----------------------------------------------------------------------------
def diag_attn_kernel(lens_ref, words_ref, ctx_ref, attn_ref,
                     *, temp_attention, t_valid):
    i = pl.program_id(0)
    Tp, Dp = ctx_ref.shape[1], ctx_ref.shape[2]
    Lp = words_ref.shape[2]
    NEG = jnp.float32(-1e30)

    cap_len = lens_ref[i]
    w = words_ref[0]                                                    # (Dp, Lp)
    c = ctx_ref[0]                                                      # (Tp, Dp)

    s = jnp.dot(c, w, preferred_element_type=jnp.float32)               # (Tp, Lp)
    lmask = jax.lax.broadcasted_iota(jnp.int32, (1, Lp), 1) < cap_len
    tmask = jax.lax.broadcasted_iota(jnp.int32, (Tp, 1), 0) < t_valid

    aq = _softmax(jnp.where(lmask, s, NEG), axis=-1)
    ac = _softmax(jnp.where(tmask, aq * jnp.float32(temp_attention), NEG), axis=0)
    attn_ref[...] = ac[None]                                            # (1, Tp, Lp)


def local_similarity(img_local, text_local, lens, *, temp_attention,
                     temp_similarity, cos_eps=1e-8, image_block=16):
    B, D, H, W = img_local.shape
    T = H * W
    Lmax = text_local.shape[2]

    # lane / sublane padding
    Dp = _round_up(D, 128)
    Lp = _round_up(Lmax, 128)
    Tp = _round_up(T, 16)

    # image-block tiling (outer grid axis) — caps the VMEM working set.
    if B <= image_block:
        bi, nbi = B, 1
    else:
        bi = _round_up(image_block, 8)       # sublane-aligned sim block when tiling
        nbi = pl.cdiv(B, bi)
    b_img = nbi * bi

    # ctx: (B, T, D) with D on lanes, bf16 for the MXU (f32 accumulation inside)
    ctx = jnp.transpose(img_local.reshape(B, D, T), (0, 2, 1))
    ctx = jnp.pad(ctx, ((0, b_img - B), (0, Tp - T), (0, Dp - D))).astype(jnp.bfloat16)

    # words pre-cast to bf16 (MXU operand only); exact f32 word norms precomputed
    words_bf = jnp.pad(text_local, ((0, 0), (0, Dp - D), (0, Lp - Lmax))
                       ).astype(jnp.bfloat16)
    w_norm = jnp.sqrt(jnp.sum(jnp.square(text_local.astype(jnp.float32)),
                              axis=1, keepdims=True))                   # (B,1,Lmax)
    w_norm = jnp.pad(w_norm, ((0, 0), (0, 0), (0, Lp - Lmax)))          # (B,1,Lp)

    sim_kernel = functools.partial(local_sim_kernel,
                                   temp_attention=float(temp_attention),
                                   temp_similarity=float(temp_similarity),
                                   cos_eps=float(cos_eps), t_valid=T)

    sim3 = pl.pallas_call(
        sim_kernel,
        out_shape=jax.ShapeDtypeStruct((B, b_img, 1), jnp.float32),
        grid_spec=pltpu.PrefetchScalarGridSpec(
            num_scalar_prefetch=1,
            grid=(nbi, B),                               # image blocks outer
            in_specs=[pl.BlockSpec((1, Dp, Lp), lambda j, i, lens: (i, 0, 0)),
                      pl.BlockSpec((1, 1, Lp), lambda j, i, lens: (i, 0, 0)),
                      pl.BlockSpec((bi, Tp, Dp), lambda j, i, lens: (j, 0, 0))],
            out_specs=pl.BlockSpec((1, bi, 1), lambda j, i, lens: (i, j, 0)),
        ),
        compiler_params=pltpu.CompilerParams(
            dimension_semantics=("parallel", "arbitrary")),
    )(lens, words_bf, w_norm, ctx)

    attn_kernel = functools.partial(diag_attn_kernel,
                                    temp_attention=float(temp_attention), t_valid=T)
    attn_tl = pl.pallas_call(
        attn_kernel,
        out_shape=jax.ShapeDtypeStruct((B, Tp, Lp), jnp.float32),
        grid_spec=pltpu.PrefetchScalarGridSpec(
            num_scalar_prefetch=1,
            grid=(B,),
            in_specs=[pl.BlockSpec((1, Dp, Lp), lambda i, lens: (i, 0, 0)),
                      pl.BlockSpec((1, Tp, Dp), lambda i, lens: (i, 0, 0))],
            out_specs=pl.BlockSpec((1, Tp, Lp), lambda i, lens: (i, 0, 0)),
        ),
        compiler_params=pltpu.CompilerParams(dimension_semantics=("parallel",)),
    )(lens, words_bf, ctx)

    sim_t = sim3[:, :B, 0]            # rows = captions, cols = images
    return sim_t, attn_tl             # attn_tl: (B, Tp, Lp), untransposed


# ----------------------------------------------------------------------------
# Fused loss epilogue: local bidirectional CE + global cosine sims + global CE
# in a single tiny pallas_call.
# ----------------------------------------------------------------------------
def loss_kernel(sim_ref, img_ref, txt_ref, out_ref, *, temp_loss, eps):
    B = sim_ref.shape[0]
    rows = jax.lax.broadcasted_iota(jnp.int32, (B, B), 0)
    cols = jax.lax.broadcasted_iota(jnp.int32, (B, B), 1)
    diag = rows == cols
    inv_b = jnp.float32(1.0 / B)

    def ce_rows(m):    # samples along rows
        mx = jnp.max(m, axis=-1, keepdims=True)
        lse = mx + jnp.log(jnp.sum(jnp.exp(m - mx), axis=-1, keepdims=True))
        d = jnp.sum(jnp.where(diag, m, 0.0), axis=-1, keepdims=True)
        return jnp.sum(lse - d, axis=0, keepdims=True) * inv_b          # (1,1)

    def ce_cols(m):    # samples along columns
        mx = jnp.max(m, axis=0, keepdims=True)
        lse = mx + jnp.log(jnp.sum(jnp.exp(m - mx), axis=0, keepdims=True))
        d = jnp.sum(jnp.where(diag, m, 0.0), axis=0, keepdims=True)
        return jnp.sum(lse - d, axis=1, keepdims=True) * inv_b          # (1,1)

    # local: sim_ref rows = captions, cols = images (torch matrix transposed)
    x = sim_ref[...] * jnp.float32(temp_loss)
    l_i2t = ce_cols(x)          # image-to-text: samples = images (columns)
    l_t2i = ce_rows(x)          # text-to-image: samples = captions (rows)

    # global cosine similarities (rows = images, cols = texts), scaled by temp
    im = img_ref[...]
    tx = txt_ref[...]
    sims = jnp.einsum('rd,cd->rc', im, tx, preferred_element_type=jnp.float32)
    im_n = jnp.sqrt(jnp.sum(im * im, axis=-1, keepdims=True))           # (B,1)
    tx_n = jnp.sqrt(jnp.sum(tx * tx, axis=-1, keepdims=True))           # (B,1)
    norm = jnp.maximum(jnp.einsum('rk,ck->rc', im_n, tx_n,
                                  preferred_element_type=jnp.float32),
                       jnp.float32(eps))
    g = sims / norm * jnp.float32(temp_loss)                            # exact div
    g_i2t = ce_rows(g)
    g_t2i = ce_cols(g)

    lane = jax.lax.broadcasted_iota(jnp.int32, (1, 4), 1)
    out_ref[...] = (jnp.where(lane == 0, l_i2t, 0.0)
                    + jnp.where(lane == 1, l_t2i, 0.0)
                    + jnp.where(lane == 2, g_i2t, 0.0)
                    + jnp.where(lane == 3, g_t2i, 0.0))


def fused_losses(sim_t, img_global, txt_global, *, temp_loss, eps=1e-8):
    out = pl.pallas_call(
        functools.partial(loss_kernel, temp_loss=float(temp_loss), eps=float(eps)),
        out_shape=jax.ShapeDtypeStruct((1, 4), jnp.float32),
    )(sim_t.astype(jnp.float32), img_global.astype(jnp.float32),
      txt_global.astype(jnp.float32))
    return out[0, 0], out[0, 1], out[0, 2], out[0, 3]


# ----------------------------------------------------------------------------
# GloriaLoss (JAX / Pallas version)
# ----------------------------------------------------------------------------
LossResult = namedtuple('LossResult', [
    'total_loss', 'attn_maps', 'global_loss', 'local_loss',
    'local_loss_image_to_text', 'local_loss_text_to_image',
    'global_loss_image_to_text', 'global_loss_text_to_image'])


class GloriaLossPallas:
    def __init__(self, config, bulk_attention_maps=False, image_block=16):
        g = config.model.gloria
        self.temp_attention = g.temp_attention
        self.temp_similarity = g.temp_similarity
        self.temp_loss = g.temp_loss
        self.local_loss_weight = g.local_loss_weight
        self.global_loss_weight = g.global_loss_weight
        self.eps = 1e-8
        # bulk_attention_maps=True returns one (B, L, H, W) array + cap_lens
        # instead of B per-sample slices (removes B-1 tiny dispatches).
        self.bulk_attention_maps = bulk_attention_maps
        self.image_block = image_block

    def __call__(self, img_emb_local, img_emb_global, text_emb_local,
                 text_emb_global, sents):
        B, _, H, W = img_emb_local.shape
        T = H * W
        Lmax = text_emb_local.shape[2]

        # caption lengths from tokenized sentences (host Python glue, as in torch)
        cap_lens_py = [min(len([w for w in sent if not w.startswith('[')]) + 1, Lmax)
                       for sent in sents]
        cap_lens = jnp.asarray(cap_lens_py, dtype=jnp.int32)

        # ------ local similarity + diagonal attention maps ------
        sim_t, attn_tl = local_similarity(
            img_emb_local, text_emb_local, cap_lens,
            temp_attention=self.temp_attention,
            temp_similarity=self.temp_similarity,
            cos_eps=self.eps, image_block=self.image_block)

        # ------ fused local CE + global cosine + global CE ------
        l_i2t, l_t2i, g_i2t, g_t2i = fused_losses(
            sim_t, img_emb_global, text_emb_global,
            temp_loss=self.temp_loss, eps=self.eps)

        # (B, Tp, Lp) -> (B, L, T) -> (B, L, H, W); transpose fused by XLA here.
        attn_lt = jnp.swapaxes(attn_tl, 1, 2)[:, :, :T]
        attn_hw = attn_lt.reshape(B, attn_lt.shape[1], H, W)

        if self.bulk_attention_maps:
            attn_maps = (attn_hw, cap_lens)
        else:
            # Matches torch semantics: list of (1, cap_len_i, H, W) arrays.
            attn_maps = [attn_hw[i:i + 1, :cap_lens_py[i]] for i in range(B)]

        local_loss = (l_i2t + l_t2i) * self.local_loss_weight
        global_loss = (g_i2t + g_t2i) * self.global_loss_weight
        total_loss = local_loss + global_loss

        return LossResult(total_loss=total_loss, attn_maps=attn_maps,
                          global_loss=global_loss, local_loss=local_loss,
                          local_loss_image_to_text=l_i2t,
                          local_loss_text_to_image=l_t2i,
                          global_loss_image_to_text=g_i2t,
                          global_loss_text_to_image=g_t2i)


if __name__ == "__main__":
    # deterministic config (mirrors config.model.gloria.*)
    config = SimpleNamespace(model=SimpleNamespace(gloria=SimpleNamespace(
        temp_attention=4.0, temp_similarity=5.0, temp_loss=10.0,
        local_loss_weight=1.0, global_loss_weight=1.0)))

    B, D, H, W, Lmax = 2, 32, 4, 4, 8

    key = jax.random.PRNGKey(0)
    k1, k2, k3, k4 = jax.random.split(key, 4)
    img_emb_local = jax.random.normal(k1, (B, D, H, W), dtype=jnp.float32)   # NCHW
    img_emb_global = jax.random.normal(k2, (B, D), dtype=jnp.float32)
    text_emb_local = jax.random.normal(k3, (B, D, Lmax), dtype=jnp.float32)
    text_emb_global = jax.random.normal(k4, (B, D), dtype=jnp.float32)
    sents = [
        ['[CLS]', 'heart', 'size', 'normal', '[SEP]'],
        ['[CLS]', 'no', 'acute', 'disease', 'is', 'seen', '[SEP]'],
    ]

    loss_fn = GloriaLossPallas(config)
    result = loss_fn(img_emb_local, img_emb_global, text_emb_local,
                     text_emb_global, sents)

    jax.block_until_ready(result.total_loss)
    for amap in result.attn_maps:
        jax.block_until_ready(amap)

    print("KERNEL_OK")
</pallas_src>

<mosaic_0001>
module attributes {stable_mosaic.version = 11 : i64} {
  func.func @local_sim_kernel(%arg0: i32, %arg1: i32, %arg2: memref<2xi32, #tpu.memory_space<smem>>, %arg3: memref<1x128x128xbf16, #tpu.memory_space<vmem>>, %arg4: memref<1x1x128xf32, #tpu.memory_space<vmem>>, %arg5: memref<2x16x128xbf16, #tpu.memory_space<vmem>>, %arg6: memref<1x2x1xf32, #tpu.memory_space<vmem>>) attributes {dimension_semantics = [#tpu.dimension_semantics<parallel>, #tpu.dimension_semantics<arbitrary>], iteration_bounds = array<i64: 1, 2>, scalar_prefetch = 1 : i64, scratch_operands = 0 : i64, tpu.core_type = #tpu.core_type<tc>, window_params = [{transform_indices = @transform_0, window_bounds = array<i64: 1, 128, 128>}, {transform_indices = @transform_1, window_bounds = array<i64: 1, 1, 128>}, {transform_indices = @transform_2, window_bounds = array<i64: 2, 16, 128>}, {transform_indices = @transform_3, window_bounds = array<i64: 1, 2, 1>}]} {
    %0 = arith.index_cast %arg1 : i32 to index
    %1 = memref.load %arg2[%0] : memref<2xi32, #tpu.memory_space<smem>>
    %c0 = arith.constant 0 : index
    %c0_0 = arith.constant 0 : index
    %c0_1 = arith.constant 0 : index
    %2 = vector.load %arg3[%c0, %c0_0, %c0_1] : memref<1x128x128xbf16, #tpu.memory_space<vmem>>, vector<1x128x128xbf16>
    %3 = vector.shape_cast %2 : vector<1x128x128xbf16> to vector<128x128xbf16>
    %c0_2 = arith.constant 0 : index
    %c0_3 = arith.constant 0 : index
    %c0_4 = arith.constant 0 : index
    %4 = vector.load %arg5[%c0_2, %c0_3, %c0_4] : memref<2x16x128xbf16, #tpu.memory_space<vmem>>, vector<2x16x128xbf16>
    %5 = tpu.iota {dimensions = array<i32: 2>} : vector<1x1x128xi32>
    %6 = vector.broadcast %1 : i32 to vector<1x1x128xi32>
    %7 = arith.cmpi slt, %5, %6 : vector<1x1x128xi32>
    %8 = tpu.iota {dimensions = array<i32: 1>} : vector<1x16x1xi32>
    %c16_i32 = arith.constant 16 : i32
    %9 = vector.broadcast %c16_i32 : i32 to vector<1x16x1xi32>
    %10 = arith.cmpi slt, %8, %9 : vector<1x16x1xi32>
    %11 = vector.shape_cast %4 : vector<2x16x128xbf16> to vector<32x128xbf16>
    %cst = arith.constant dense<0.000000e+00> : vector<32x128xf32>
    %12 = tpu.matmul %11, %3, %cst {dimension_numbers = #tpu.dot_dimension_numbers<[1], [0], [0], [1], [0, 0, 1, 1], [], []>} : vector<32x128xbf16>, vector<128x128xbf16>, vector<32x128xf32> -> vector<32x128xf32>
    %13 = vector.shape_cast %12 : vector<32x128xf32> to vector<2x16x128xf32>
    %cst_5 = arith.constant -1.000000e+30 : f32
    %14 = vector.shape_cast %7 : vector<1x1x128xi1> to vector<1x1x128xi1>
    %15 = vector.broadcast %14 : vector<1x1x128xi1> to vector<2x16x128xi1>
    %16 = vector.broadcast %cst_5 : f32 to vector<2x16x128xf32>
    %17 = arith.select %15, %13, %16 : vector<2x16x128xi1>, vector<2x16x128xf32>
    %cst_6 = arith.constant dense<0xFF800000> : vector<2x16xf32>
    %18 = vector.multi_reduction <maximumf>, %17, %cst_6 [2] : vector<2x16x128xf32> to vector<2x16xf32>
    %19 = vector.shape_cast %18 : vector<2x16xf32> to vector<2x16x1xf32>
    %20 = vector.broadcast %19 : vector<2x16x1xf32> to vector<2x16x128xf32>
    %21 = arith.subf %17, %20 : vector<2x16x128xf32>
    %22 = math.exp %21 : vector<2x16x128xf32>
    %cst_7 = arith.constant dense<0.000000e+00> : vector<2x16xf32>
    %23 = vector.multi_reduction <add>, %22, %cst_7 [2] : vector<2x16x128xf32> to vector<2x16xf32>
    %24 = vector.shape_cast %23 : vector<2x16xf32> to vector<2x16x1xf32>
    %25 = tpu.reciprocal %24 {approx = true} : vector<2x16x1xf32> -> vector<2x16x1xf32>
    %26 = vector.broadcast %25 : vector<2x16x1xf32> to vector<2x16x128xf32>
    %27 = arith.mulf %22, %26 : vector<2x16x128xf32>
    %cst_8 = arith.constant 4.000000e+00 : f32
    %28 = vector.broadcast %cst_8 : f32 to vector<2x16x128xf32>
    %29 = arith.mulf %27, %28 : vector<2x16x128xf32>
    %cst_9 = arith.constant -1.000000e+30 : f32
    %30 = vector.shape_cast %10 : vector<1x16x1xi1> to vector<1x16x1xi1>
    %31 = vector.broadcast %30 : vector<1x16x1xi1> to vector<2x16x128xi1>
    %32 = vector.broadcast %cst_9 : f32 to vector<2x16x128xf32>
    %33 = arith.select %31, %29, %32 : vector<2x16x128xi1>, vector<2x16x128xf32>
    %cst_10 = arith.constant dense<0xFF800000> : vector<2x128xf32>
    %34 = vector.multi_reduction <maximumf>, %33, %cst_10 [1] : vector<2x16x128xf32> to vector<2x128xf32>
    %35 = vector.shape_cast %34 : vector<2x128xf32> to vector<2x1x128xf32>
    %36 = vector.broadcast %35 : vector<2x1x128xf32> to vector<2x16x128xf32>
    %37 = arith.subf %33, %36 : vector<2x16x128xf32>
    %38 = math.exp %37 : vector<2x16x128xf32>
    %cst_11 = arith.constant dense<0.000000e+00> : vector<2x128xf32>
    %39 = vector.multi_reduction <add>, %38, %cst_11 [1] : vector<2x16x128xf32> to vector<2x128xf32>
    %40 = vector.shape_cast %39 : vector<2x128xf32> to vector<2x1x128xf32>
    %41 = tpu.reciprocal %40 {approx = true} : vector<2x1x128xf32> -> vector<2x1x128xf32>
    %42 = vector.broadcast %41 : vector<2x1x128xf32> to vector<2x16x128xf32>
    %43 = arith.mulf %38, %42 : vector<2x16x128xf32>
    %44 = arith.truncf %43 : vector<2x16x128xf32> to vector<2x16x128xbf16>
    "tpu.trace_start"() <{level = 10 : i32, message = "btl,btd->bld"}> : () -> ()
    %cst_12 = arith.constant dense<0.000000e+00> : vector<2x128x128xf32>
    %45 = tpu.matmul %44, %4, %cst_12 {dimension_numbers = #tpu.dot_dimension_numbers<[1], [1], [2], [2], [0, 0, 0, 2, 1, 2], [0], [0]>} : vector<2x16x128xbf16>, vector<2x16x128xbf16>, vector<2x128x128xf32> -> vector<2x128x128xf32>
    "tpu.trace_stop"() : () -> ()
    %46 = arith.mulf %43, %13 : vector<2x16x128xf32>
    %cst_13 = arith.constant dense<0.000000e+00> : vector<2x128xf32>
    %47 = vector.multi_reduction <add>, %46, %cst_13 [1] : vector<2x16x128xf32> to vector<2x128xf32>
    %48 = arith.mulf %45, %45 : vector<2x128x128xf32>
    %cst_14 = arith.constant dense<0.000000e+00> : vector<2x128xf32>
    %49 = vector.multi_reduction <add>, %48, %cst_14 [2] : vector<2x128x128xf32> to vector<2x128xf32>
    %50 = math.sqrt %49 : vector<2x128xf32>
    %c0_15 = arith.constant 0 : index
    %c0_16 = arith.constant 0 : index
    %c0_17 = arith.constant 0 : index
    %51 = vector.load %arg4[%c0_15, %c0_16, %c0_17] : memref<1x1x128xf32, #tpu.memory_space<vmem>>, vector<1x1x128xf32>
    %52 = vector.shape_cast %51 : vector<1x1x128xf32> to vector<1x128xf32>
    %cst_18 = arith.constant 9.99999993E-9 : f32
    %53 = vector.broadcast %cst_18 : f32 to vector<1x128xf32>
    %54 = arith.maximumf %52, %53 : vector<1x128xf32>
    %cst_19 = arith.constant 9.99999993E-9 : f32
    %55 = vector.broadcast %cst_19 : f32 to vector<2x128xf32>
    %56 = arith.maximumf %50, %55 : vector<2x128xf32>
    %57 = vector.broadcast %54 : vector<1x128xf32> to vector<2x128xf32>
    %58 = arith.mulf %57, %56 : vector<2x128xf32>
    %59 = arith.divf %47, %58 : vector<2x128xf32>
    %cst_20 = arith.constant 5.000000e+00 : f32
    %60 = vector.broadcast %cst_20 : f32 to vector<2x128xf32>
    %61 = arith.mulf %59, %60 : vector<2x128xf32>
    %62 = math.exp %61 : vector<2x128xf32>
    %63 = tpu.iota {dimensions = array<i32: 1>} : vector<1x128xi32>
    %64 = vector.broadcast %1 : i32 to vector<1x128xi32>
    %65 = arith.cmpi slt, %63, %64 : vector<1x128xi32>
    %cst_21 = arith.constant 0.000000e+00 : f32
    %66 = vector.shape_cast %65 : vector<1x128xi1> to vector<1x128xi1>
    %67 = vector.broadcast %66 : vector<1x128xi1> to vector<2x128xi1>
    %68 = vector.broadcast %cst_21 : f32 to vector<2x128xf32>
    %69 = arith.select %67, %62, %68 : vector<2x128xi1>, vector<2x128xf32>
    %cst_22 = arith.constant dense<0.000000e+00> : vector<2xf32>
    %70 = vector.multi_reduction <add>, %69, %cst_22 [1] : vector<2x128xf32> to vector<2xf32>
    %71 = vector.shape_cast %70 : vector<2xf32> to vector<2x1xf32>
    %72 = math.log %71 : vector<2x1xf32>
    %73 = vector.shape_cast %72 : vector<2x1xf32> to vector<1x2x1xf32>
    %c0_23 = arith.constant 0 : index
    %c0_24 = arith.constant 0 : index
    %c0_25 = arith.constant 0 : index
    %74 = vector.load %arg6[%c0_23, %c0_24, %c0_25] : memref<1x2x1xf32, #tpu.memory_space<vmem>>, vector<1x2x1xf32>
    tpu.vector_store %arg6[%c0_23, %c0_24, %c0_25], %73 {strides = array<i32>} : memref<1x2x1xf32, #tpu.memory_space<vmem>>, vector<1x2x1xf32>,
    return
  }
  func.func @transform_0(%arg0: i32, %arg1: i32, %arg2: memref<2xi32, #tpu.memory_space<smem>>) -> (i32, i32, i32) {
    %c0_i32 = arith.constant 0 : i32
    %c0_i32_0 = arith.constant 0 : i32
    %c0_i32_1 = arith.constant 0 : i32
    return %arg1, %c0_i32, %c0_i32_0 : i32, i32, i32
  }
  func.func @transform_1(%arg0: i32, %arg1: i32, %arg2: memref<2xi32, #tpu.memory_space<smem>>) -> (i32, i32, i32) {
    %c0_i32 = arith.constant 0 : i32
    %c0_i32_0 = arith.constant 0 : i32
    %c0_i32_1 = arith.constant 0 : i32
    return %arg1, %c0_i32, %c0_i32_0 : i32, i32, i32
  }
  func.func @transform_2(%arg0: i32, %arg1: i32, %arg2: memref<2xi32, #tpu.memory_space<smem>>) -> (i32, i32, i32) {
    %c0_i32 = arith.constant 0 : i32
    %c0_i32_0 = arith.constant 0 : i32
    %c0_i32_1 = arith.constant 0 : i32
    return %arg0, %c0_i32, %c0_i32_0 : i32, i32, i32
  }
  func.func @transform_3(%arg0: i32, %arg1: i32, %arg2: memref<2xi32, #tpu.memory_space<smem>>) -> (i32, i32, i32) {
    %c0_i32 = arith.constant 0 : i32
    %c0_i32_0 = arith.constant 0 : i32
    return %arg1, %arg0, %c0_i32 : i32, i32, i32
  }
}

</mosaic_0001>

<bundles_post_ra>
// kernel: tpu_custom_call.1
= control target key start
LH: loop header
LB: loop body
LE: loop exit
PB: predicated region body
PF: predicated region fallthrough
CT: control target
= control target key end

     0   :  { %s2697_s0 = inlined_call_operand.hbm [shape: s32[2], index: 0, kind: input, shape index: {}]   ;;  %s2698_s1 = inlined_call_operand.hbm [shape: bf16[2,128,128], index: 1, kind: input, shape index: {}]   ;;  %s2699_s2 = inlined_call_operand.vmem [shape: f32[2,1,128], index: 2, kind: input, shape index: {}]   ;;  %s2700_s3 = inlined_call_operand.hbm [shape: bf16[2,16,128], index: 3, kind: input, shape index: {}]   ;;  %s2701_s4 = inlined_call_operand.vmem [shape: f32[2,2,1], index: 4, kind: output, shape index: {}]  }
   0x1   :  { %s1813_s17 = scalar_lea.hbm %s2697_s0, 16 }
   0x2   :  { %p1814_p0 = scmp.ne.s32.totalorder %s2697_s0, %s1813_s17  ;;  %p1817_p1 = scmp.lt.u32.totalorder %s1813_s17, %s2697_s0 }
   0x4   :  { %p1819_p2 = pnand %p1817_p1, %p1814_p0 }
   0x6   :  { %1822 = shalt.err (!%p1819_p2)  }
   0x7   :  { %s1939_s22 = smov [#allocation3]  }
   0x8   :  { %10 = dma.hbm_to_smem %s2697_s0, 16, %s1939_s22, [#allocation2] }
   0x9   :  { %1905 = dma.done.wait [#allocation2], 16 }
   0xa   :  { %1906 = vsyncadd [#allocation2], 4294967280 }
   0xb   :  { %12 = sfence }
   0xc   :  { %13 = vsyncpa [#allocation5], 0 }
   0xd   :  { %15 = vsyncpa [#allocation5 + $0x1], 0 }
   0xe   :  { %16 = vsyncpa [#allocation7], 0  ;;  %s1981_s25 = smov 0   ;;  %s1983_s26 = smov 0  }
   0xf   :  { %s1985_s27 = smov 0   ;;  %s1987_s28 = smov 0  }
  0x10   :  { %s1989_s29 = smov 0   ;;  %s1991_s30 = smov 0  }
  0x11 LB: > { %s1504_s0 = sadd.s32 4294967295, %s1937_s30   ;;  %p54_p3 = scmp.ne.s32.totalorder %s1921_s26, %s1917_s25  ;;  %s1937_s30 = sphi %s1991_s30, %s22_s30   ;;  %s1933_s29 = sphi %s1989_s29, %s2726_s29   ;;  %s1929_s28 = sphi %s1987_s28, %s2725_s28   ;;  %s1925_s27 = sphi %s1985_s27, %s2724_s27   ;;  %s1921_s26 = sphi %s1983_s26, %s2723_s26   ;;  %s1917_s25 = sphi %s1981_s25, %s2722_s25  }
  0x12   : > { %p2011_p4 = scmp.eq.s32.totalorder %s1504_s0, 0  ;;  %p1506_p5 = scmp.ge.s32.totalorder %s1937_s30, 1 }
  0x13   : > { %p145_p6 = scmp.lt.s32.totalorder %s1937_s30, 3  ;;  %s1940_s8 = smov [#allocation6]  }
  0x14   : > { %s2709_s5 = scalar_select %p2011_p4, 1, 0 }
  0x15   : > { %p2019_p7 = por %p2011_p4, %p54_p3  ;;  %p2023_p8 = pnand %p1506_p5, %p145_p6 }
  0x16   : > { %s161_s9 = sshll.u32 %s1940_s8, 4  ;;  %s31_s11 = sadd.s32 1, %s1933_s29  ;;  %s162_s9 = int_to_ptr.vmem [resolvable:$true] %s161_s9 }
  0x17   : > { %s2710_s6 = scalar_select %p2019_p7, 1, 0 }
  0x18   : > { %s2711_s7 = scalar_select %p2023_p8, 1, 0 }
  0x19   : > { %p1637_p9 = pneg %p2023_p8  ;;  %s1823_s14 = scalar_lea.hbm %s2700_s3, 256 }
  0x1a   : > { %p1824_p11 = scmp.ne.s32.totalorder %s2700_s3, %s1823_s14  ;;  %p1830_p1 = scmp.lt.u32.totalorder %s1823_s14, %s2700_s3 }
  0x1b   : > { %p2031_p10 = pnand %p1637_p9, %p2011_p4 }
  0x1d   : > { %p1825_p12 = pneg %p2031_p10 }
  0x1f   : > { %p1826_p13 = pnand %p1825_p12, %p1824_p11 }
  0x21   : > { %p1827_p0 = pneg %p1826_p13 }
  0x23   : > { %p1832_p2 = pnand %p1830_p1, %p1827_p0 }
  0x25   : > { %1835 = shalt.err (!%p1832_p2)
}
  0x26   : > { %s1836_s19 = scalar_lea.vmem %s162_s9, 256  ;;  %p1844_p9 = scmp.lt.s32.totalorder %s162_s9, %s162_s9 }
  0x27   : > { %p1837_p3 = scmp.ne.s32.totalorder %s162_s9, %s1836_s19  ;;  %p1845_p4 = scmp.lt.s32.totalorder %s1836_s19, %s1836_s19 }
  0x29   : > { %p1839_p5 = pnand %p1837_p3, %p1825_p12  ;;  %p1846_p7 = por %p1845_p4, %p1844_p9 }
  0x2b   : > { %p1840_p6 = pneg %p1839_p5 }
  0x2d   : > { %p1847_p8 = pnand %p1846_p7, %p1840_p6 }
  0x2f   : > { %1850 = shalt.err (!%p1847_p8)
}
  0x30   : > { %s1941_s20 = smov 64   ;;  %s1942_s21 = smov 4  }
  0x31   : > { %1640 = dma.hbm_to_vmem [thread:$0]  (!%p2031_p10), %s2700_s3, 256, %s162_s9, [#allocation7], %s1941_s20, %s1941_s20, %s1942_s21  }
  0x32   : > { %p32_p4 = scmp.ge.s32.totalorder %s31_s11, 2  ;;  %s41_s24 = sadd.s32 1, %s1925_s27 }
  0x33   : > { %p48_p7 = scmp.ne.s32.totalorder %s1925_s27, %s1921_s26  ;;  %p49_p8 = scmp.eq.s32.totalorder %s1937_s30, 0 }
  0x34   : > { %s2728_s11 = smov (%p32_p4, %s31_s11), 0  ;;  %p1646_p12 = scmp.lt.s32.totalorder %s1937_s30, 2 }
  0x35   : > { %p50_p11 = por %p49_p8, %p48_p7  ;;  %s38_s25 = ssub.s32 %s1933_s29, %s2728_s11 }
  0x36   : > { %s175_s0 = sand.u32 1, %s1925_s27   ;;  %p39_p13 = scmp.eq.s32.totalorder %s38_s25, 0 }
  0x37   : > { %s1509_s8 = sshll.u32 %s175_s0, 6  ;;  %s1544_s10 = sshll.u32 %s1933_s29, 10 }
  0x38   : > { %s2067_s12 = scalar_select %p39_p13, %s1925_s27, %s41_s24  }
  0x39   : > { %s2072_s9 = scalar_lea.hbm %s2698_s1, %s1544_s10  ;;  %s179_s15 = scalar_lea.vmem [#allocation4], %s1509_s8 }
  0x3a   : > { %s186_s16 = sshll.u32 %s179_s15, 4  ;;  %p2074_p10 = pnand %p1646_p12, %p50_p11  ;;  %s2078_s16 = int_to_ptr.vmem [resolvable:$true] %s186_s16 }
  0x3b   : > { %s2080_s18 = scalar_lea.sflag [#allocation5], %s175_s0  ;;  %s1851_s19 = scalar_lea.hbm %s2072_s9, 1024 }
  0x3c   : > { %p1852_p0 = scmp.ne.s32.totalorder %s2072_s9, %s1851_s19  ;;  %p1853_p1 = pneg %p2074_p10 }
  0x3d   : > { %s1856_s24 = scalar_lea.hbm %s2698_s1, 2048  ;;  %p1857_p5 = scmp.lt.u32.totalorder %s2072_s9, %s2698_s1 }
  0x3e   : > { %p1854_p2 = pnand %p1853_p1, %p1852_p0  ;;  %p1858_p6 = scmp.lt.u32.totalorder %s1856_s24, %s1851_s19 }
  0x3f   : > { %p1860_p4 = scmp.lt.u32.totalorder %s1851_s19, %s2072_s9 }
  0x40   : > { %p1855_p3 = pneg %p1854_p2  ;;  %p1859_p9 = por %p1858_p6, %p1857_p5 }
  0x42   : > { %p1861_p7 = por %p1860_p4, %p1859_p9 }
  0x44   : > { %p1862_p8 = pnand %p1861_p7, %p1855_p3 }
  0x46   : > { %1865 = shalt.err (!%p1862_p8)
}
  0x47   : > { %s1866_s0 = scalar_lea.vmem %s2078_s16, 1024  ;;  %s1943_s10 = smov [#allocation4]  }
  0x48   : > { %p1867_p11 = scmp.ne.s32.totalorder %s2078_s16, %s1866_s0  ;;  %s1871_s13 = sshll.u32 %s1943_s10, 4  ;;  %s1872_s13 = int_to_ptr.vmem [resolvable:$false] %s1871_s13 }
  0x49   : > { %s1873_s14 = scalar_lea.vmem %s1872_s13, 2048  ;;  %p1874_p0 = scmp.lt.s32.totalorder %s2078_s16, %s1872_s13 }
  0x4a   : > { %p1869_p12 = pnand %p1867_p11, %p1853_p1  ;;  %p1875_p2 = scmp.lt.s32.totalorder %s1873_s14, %s1866_s0 }
  0x4c   : > { %p1870_p13 = pneg %p1869_p12  ;;  %p1876_p5 = por %p1875_p2, %p1874_p0 }
  0x4e   : > { %p1877_p6 = pnand %p1876_p5, %p1870_p13 }
  0x50   : > { %1880 = shalt.err (!%p1877_p6)
}
  0x51   : > { %1644 = dma.hbm_to_vmem [thread:$0]  (!%p2074_p10), %s2072_s9, 1024, %s2078_s16, %s2080_s18, %s1941_s20, %s1941_s20, %s1942_s21  }
  0x52   : > { %p2714_p1 = scmp.ne.s32.totalorder %s2711_s7, 0 }
  0x53   : > { %s206_s15 = sand.u32 (!%p2714_p1), 1, %s1921_s26   ;;  %p2715_p3 = scmp.ne.s32.totalorder (!%p2714_p1), %s2710_s6, 0 }
  0x54   : > { %204 = sbr.rel (%p2714_p1) target bundleno = 1484 (0x5cc), region = 32  ;;  %s1513_s19 = sshll.u32 (!%p2714_p1), %s206_s15, 6 }
  0x55   : > { %s207_s22 = scalar_lea.sflag (!%p2714_p1), [#allocation5], %s206_s15  ;;  %s2114_s23 = scalar_lea.vmem (!%p2714_p1), [#allocation4], %s1513_s19 }
  0x5b   : > { %1908 = dma.done.wait (%p2715_p3), %s207_s22, 1024  }
  0x5c   : > { %1910 = vsyncadd (%p2715_p3), %s207_s22, 4294966272  ;;  %p2716_p9 = scmp.ne.s32.totalorder %s2709_s5, 0 }
  0x5e   : > { %1912 = dma.done.wait (%p2716_p9), [#allocation7], 256  }
  0x5f   : > { %1914 = vsyncadd (%p2716_p9), [#allocation7], 4294967040  ;;  %v1701_v0 = vld [vmem:[%s2114_s23] sm:$0xff]   ;;  %v1702_v1 = vld [vmem:[%s2114_s23 + $0x8] sm:$0xff]   ;;  %s254_s5 = sld [smem:[#allocation3 + %s1929_s28]]  ;;  %v275_v10 = vlaneseq  ;;  %vm511_vm1 = vcmask 130048  }
  0x60   : > { %1573 = vmatprep.subr.bf16.mxu0 %v1701_v0  ;;  %v1703_v2 = vld [vmem:[%s2114_s23 + $0x10] sm:$0xff]   ;;  %v1704_v3 = vld [vmem:[%s2114_s23 + $0x18] sm:$0xff]   ;;  %v1709_v4 = vld [vmem:[#allocation6] sm:$0xff]   ;;  %vm1189_vm7 = vcmask 130112   ;;  %p242_p10 = scmp.lt.s32.totalorder %s1929_s28, 1  ;;  %vm1196_vm10 = vcmask 195712  }
  0x61   : > { %1574 = vmatpush3.bf16.msra.mxu0 %v1701_v0  ;;  %1589 = vmatprep.mubr.bf16.mxu0 %v1709_v4  ;;  %v2128_v5 = vld [vmem:[#allocation6 + $0x8] sm:$0xff]   ;;  %v1705_v6 = vld [vmem:[%s2114_s23 + $0x20] sm:$0xff]   ;;  %v1707_v8 = vld [vmem:[%s2114_s23 + $0x30] sm:$0xff]   ;;  %v2138_v11 = vand.u32 127, %v275_v10  ;;  %vm2708_vm12 = vcmask 261312  }
  0x62   : > { %1575 = vmatprep.subr.bf16.mxu0 %v1702_v1  ;;  %1629 = vmatprep.subr.bf16.mxu1 %v1709_v4  ;;  %v1706_v7 = vld [vmem:[%s2114_s23 + $0x28] sm:$0xff]   ;;  %v1708_v9 = vld [vmem:[%s2114_s23 + $0x38] sm:$0xff]   ;;  %s2730_s28 = smov (!%p242_p10, %s1929_s28), 1 }
  0x63   : > { %1630 = vmatpush3.bf16.msra.mxu1 %v1709_v4  ;;  %s244_s20 = scalar_lea.vmem %s2699_s2, %s2730_s28  ;;  %s1515_s21 = sshll.u32 %s2730_s28, 1 }
  0x64   : > { %1611 = vmatprep.subr.bf16.mxu1 %v2128_v5  ;;  %s252_s17 = scalar_lea.vmem %s2701_s4, %s1515_s21 }
  0x65   : > { %1576 = vmatpush3.bf16.msra.mxu0 %v1702_v1  ;;  %v277_v12 = vstv %s254_s5 }
  0x66   : > { %1577 = vmatprep.subr.bf16.mxu0 %v1703_v2  ;;  %vm2141_vm0 = vcmp.lt.s32.totalorder %v2138_v11, %v277_v12 }
  0x69   : > { %1578 = vmatpush3.bf16.msra.mxu0 %v1703_v2 }
  0x6a   : > { %1579 = vmatprep.subr.bf16.mxu0 %v1704_v3 }
  0x6d   : > { %1580 = vmatpush3.bf16.msra.mxu0 %v1704_v3 }
  0x6e   : > { %1581 = vmatprep.subr.bf16.mxu0 %v1705_v6 }
  0x71   : > { %1582 = vmatpush3.bf16.msra.mxu0 %v1705_v6 }
  0x72   : > { %1583 = vmatprep.subr.bf16.mxu0 %v1706_v7 }
  0x75   : > { %1584 = vmatpush3.bf16.msra.mxu0 %v1706_v7 }
  0x76   : > { %1585 = vmatprep.subr.bf16.mxu0 %v1707_v8 }
  0x79   : > { %1586 = vmatpush3.bf16.msra.mxu0 %v1707_v8 }
  0x7a   : > { %1587 = vmatprep.subr.bf16.mxu0 %v1708_v9 }
  0x7d   : > { %1588 = vmatpush3.bf16.msra.mxu0 %v1708_v9 }
  0x7e   : > { %1593 = vmatprep.subr.bf16.mxu0 %v1709_v4 }
  0x80   : > { %1590 = vmatmul.mubr.bf16.vlgmr.msra.gmra.mrb[0].mxu0 %v2128_v5 }
  0x81   : > { %1594 = vmatpush3.bf16.msra.mxu0 %v1709_v4 }
 0x153   : > { %v2145_v14 = vpop.f32.mrb[0].mxu0 }
 0x154   : > { %v2147_v15 = vpop.f32.mrb[1].mxu0  ;;  %v397_v16 = vsel %vm2141_vm0, %v2145_v14, -1e+30 }
 0x155   : > { %v2152_v17 = vpop.f32.mrb[2].mxu0  ;;  %403 = vmax.xlane.f32.xlu1 %v397_v16  ;;  %v395_v18 = vsel %vm2141_vm0, %v2147_v15, -1e+30 }
 0x156   : > { %v2157_v19 = vpop.f32.mrb[3].mxu0  ;;  %399 = vmax.xlane.f32.xlu0 %v395_v18  ;;  %v398_v20 = vsel %vm2141_vm0, %v2152_v17, -1e+30 }
 0x157   : > { %v396_v21 = vsel %vm2141_vm0, %v2157_v19, -1e+30 }
 0x159   : > { %405 = vmax.xlane.f32.xlu1 %v398_v20 }
 0x15a   : > { %401 = vmax.xlane.f32.xlu0 %v396_v21 }
 0x1e2   : > { %v404_v22 = vpop.xlane.xlu1 %403 }
 0x1e3   : > { %v409_v23 = vsub.f32 %v397_v16, %v404_v22  ;;  %v400_v24 = vpop.xlane.xlu0 %399 }
 0x1e4   : > { %v407_v25 = vsub.f32 %v395_v18, %v400_v24 }
 0x1e5   : > { %v415_v28 = vmul.f32 1.442695, %v409_v23 }
 0x1e6   : > { %v411_v26 = vmul.f32 1.442695, %v407_v25  ;;  %v406_v27 = vpop.xlane.xlu1 %405 }
 0x1e7   : > { %v402_v29 = vpop.xlane.xlu0 %401  ;;  %v410_v30 = vsub.f32 %v398_v20, %v406_v27 }
 0x1e8   : > { %1711 = vpow2.f32 %v411_v26  ;;  %v408_v31 = vsub.f32 %v396_v21, %v402_v29 }
 0x1e9   : > { %1713 = vpow2.f32 %v415_v28  ;;  %v417_v33 = vmul.f32 1.442695, %v410_v30 }
 0x1ea   : > { %v413_v32 = vmul.f32 1.442695, %v408_v31 }
 0x1ec   : > { %1715 = vpow2.f32 %v413_v32 }
 0x1ed   : > { %1717 = vpow2.f32 %v417_v33 }
 0x1f2   : > { %v1712_v34 = vpop.eup %1711 }
 0x1f3   : > { %419 = vadd.xlane.f32.xlu0 %v1712_v34  ;;  %v1714_v35 = vpop.eup %1713 }
 0x1f6   : > { %v1716_v36 = vpop.eup %1715 }
 0x1f7   : > { %423 = vadd.xlane.f32.xlu0 %v1714_v35  ;;  %421 = vadd.xlane.f32.xlu1 %v1716_v36  ;;  %v1718_v37 = vpop.eup %1717 }
 0x1fb   : > { %425 = vadd.xlane.f32.xlu1 %v1718_v37 }
 0x280   : > { %v420_v38 = vpop.xlane.xlu0 %419 }
 0x281   : > { %1719 = vrcp.f32 %v420_v38 }
 0x284   : > { %v422_v39 = vpop.xlane.xlu1 %421  ;;  %v424_v40 = vpop.xlane.xlu0 %423 }
 0x285   : > { %1721 = vrcp.f32 %v422_v39 }
 0x286   : > { %1723 = vrcp.f32 %v424_v40 }
 0x288   : > { %v426_v41 = vpop.xlane.xlu1 %425 }
 0x289   : > { %1725 = vrcp.f32 %v426_v41 }
 0x28b   : > { %v1720_v42 = vpop.eup %1719 }
 0x28c   : > { %v431_v43 = vmul.f32 %v1720_v42, %v1712_v34 }
 0x28e   : > { %v435_v47 = vmul.f32 4.0, %v431_v43 }
 0x28f   : > { %v1722_v44 = vpop.eup %1721 }
 0x290   : > { %v1724_v45 = vpop.eup %1723  ;;  %v432_v46 = vmul.f32 %v1722_v44, %v1716_v36 }
 0x291   : > { %v433_v49 = vmul.f32 %v1724_v45, %v1714_v35 }
 0x292   : > { %v436_v48 = vmul.f32 4.0, %v432_v46 }
 0x293   : > { %v1726_v50 = vpop.eup %1725  ;;  %v437_v54 = vmul.f32 4.0, %v433_v49 }
 0x294   : > { %v447_v51 = vmax.f32 %v435_v47, %v436_v48  ;;  %v434_v52 = vmul.f32 %v1726_v50, %v1718_v37 }
 0x296   : > { %v448_v53 = vrot.slane %v447_v51, 4  ;;  %v438_v55 = vmul.f32 4.0, %v434_v52 }
 0x298   : > { %v449_v56 = vmax.f32 %v447_v51, %v448_v53  ;;  %v454_v57 = vmax.f32 %v437_v54, %v438_v55 }
 0x29a   : > { %v450_v58 = vrot.slane %v449_v56, 2  ;;  %v455_v59 = vrot.slane %v454_v57, 4 }
 0x29c   : > { %v451_v60 = vmax.f32 %v449_v56, %v450_v58  ;;  %v456_v61 = vmax.f32 %v454_v57, %v455_v59 }
 0x29e   : > { %v452_v62 = vrot.slane %v451_v60, 1  ;;  %v457_v63 = vrot.slane %v456_v61, 2 }
 0x2a0   : > { %v453_v0 = vmax.f32 %v451_v60, %v452_v62  ;;  %v458_v1 = vmax.f32 %v456_v61, %v457_v63 }
 0x2a2   : > { %v462_v2 = vsub.f32 %v436_v48, %v453_v0  ;;  %v459_v3 = vrot.slane %v458_v1, 1  ;;  %v461_v4 = vsub.f32 %v435_v47, %v453_v0 }
 0x2a4   : > { %v467_v6 = vmul.f32 1.442695, %v462_v2  ;;  %v460_v7 = vmax.f32 %v458_v1, %v459_v3  ;;  %v465_v8 = vmul.f32 1.442695, %v461_v4 }
 0x2a6   : > { %v464_v9 = vsub.f32 %v438_v55, %v460_v7  ;;  %1727 = vpow2.f32 %v465_v8  ;;  %v463_v12 = vsub.f32 %v437_v54, %v460_v7 }
 0x2a7   : > { %1729 = vpow2.f32 %v467_v6 }
 0x2a8   : > { %v471_v16 = vmul.f32 1.442695, %v464_v9  ;;  %v469_v18 = vmul.f32 1.442695, %v463_v12 }
 0x2aa   : > { %1731 = vpow2.f32 %v469_v18 }
 0x2ab   : > { %1733 = vpow2.f32 %v471_v16 }
 0x2b0   : > { %v1728_v20 = vpop.eup %1727 }
 0x2b1   : > { %v1730_v21 = vpop.eup %1729 }
 0x2b2   : > { %v473_v22 = vadd.f32 %v1730_v21, %v1728_v20 }
 0x2b4   : > { %v1732_v23 = vpop.eup %1731  ;;  %v474_v24 = vrot.slane %v473_v22, 4 }
 0x2b5   : > { %v1734_v25 = vpop.eup %1733 }
 0x2b6   : > { %v475_v26 = vadd.f32 %v474_v24, %v473_v22  ;;  %v480_v27 = vadd.f32 %v1734_v25, %v1732_v23 }
 0x2b8   : > { %v476_v28 = vrot.slane %v475_v26, 2  ;;  %v481_v29 = vrot.slane %v480_v27, 4 }
 0x2ba   : > { %v477_v30 = vadd.f32 %v476_v28, %v475_v26  ;;  %v482_v31 = vadd.f32 %v481_v29, %v480_v27 }
 0x2bc   : > { %v478_v32 = vrot.slane %v477_v30, 1  ;;  %v483_v33 = vrot.slane %v482_v31, 2 }
 0x2be   : > { %v479_v34 = vadd.f32 %v478_v32, %v477_v30  ;;  %v484_v35 = vadd.f32 %v483_v33, %v482_v31 }
 0x2c0   : > { %1735 = vrcp.f32 %v479_v34  ;;  %v485_v36 = vrot.slane %v484_v35, 1 }
 0x2c2   : > { %v486_v37 = vadd.f32 %v485_v36, %v484_v35 }
 0x2c4   : > { %1737 = vrcp.f32 %v486_v37 }
 0x2ca   : > { %v1736_v38 = vpop.eup %1735 }
 0x2cb   : > { %v489_v39 = vmul.f32 %v1736_v38, %v1728_v20  ;;  %v490_v40 = vmul.f32 %v1736_v38, %v1730_v21 }
 0x2cd   : > { %v493_v41 = vpack.c.bf16 %v490_v40, %v489_v39  ;;  %v770_v42 = vmul.f32 %v489_v39, %v2147_v15  ;;  %v771_v43 = vmul.f32 %v490_v40, %v2157_v19 }
 0x2ce   : > { %v1738_v44 = vpop.eup %1737 }
 0x2cf   : > { %v2167_v45 = vadd.f32 %v771_v43, %v770_v42  ;;  %495 = vxpose.xlu0.c.b16.start.end [1/1] (short) %v493_v41, 128  ;;  %v491_v46 = vmul.f32 %v1738_v44, %v1732_v23  ;;  %v492_v47 = vmul.f32 %v1738_v44, %v1734_v25 }
 0x2d1   : > { %v494_v48 = vpack.c.bf16 %v492_v47, %v491_v46  ;;  %v772_v49 = vmul.f32 %v2145_v14, %v491_v46  ;;  %v773_v50 = vmul.f32 %v2152_v17, %v492_v47 }
 0x2d3   : > { %v2171_v51 = vadd.f32 %v773_v50, %v772_v49  ;;  %633 = vxpose.xlu1.c.b16.start.end [1/1] (short) %v494_v48, 128 }
 0x335   : > { %v503_v52 = vpop.trf.xlu0 }
 0x336   : > { %1595 = vmatprep.mubr.msk.bf16.mxu0 %vm511_vm1, %v503_v52 }
 0x339   : > { %v504_v15 = vpop.trf.xlu0  ;;  %v641_v54 = vpop.trf.xlu1 }
 0x33a   : > { %1596 = vmatmul.mubr.msk.bf16.vlgmr.msra.gmra.mrb[4].mxu0 %vm511_vm1, %v504_v15 }
 0x33d   : > { %v505_v19 = vpop.trf.xlu0  ;;  %v642_v56 = vpop.trf.xlu1 }
 0x33e   : > { %1599 = vmatprep.mubr.msk.bf16.mxu1 %vm511_vm1, %v505_v19 }
 0x341   : > { %v506_v53 = vpop.trf.xlu0  ;;  %v643_v58 = vpop.trf.xlu1 }
 0x342   : > { %1600 = vmatmul.mubr.msk.bf16.vlgmr.msra.gmra.mrb[0].mxu1 %vm511_vm1, %v506_v53 }
 0x343   : > { %1612 = vmatpush3.bf16.msra.mxu1 %v2128_v5 }
 0x345   : > { %v507_v14 = vpop.trf.xlu0  ;;  %v644_v5 = vpop.trf.xlu1 }
 0x346   : > { %1603 = vmatprep.mubr.msk.bf16.mxu1 %vm511_vm1, %v507_v14 }
 0x349   : > { %v508_v17 = vpop.trf.xlu0  ;;  %v645_v59 = vpop.trf.xlu1 }
 0x34a   : > { %1604 = vmatmul.mubr.msk.bf16.gmra.mrb[4].mxu1 %vm511_vm1, %v508_v17 }
 0x34d   : > { %v509_v55 = vpop.trf.xlu0  ;;  %v646_v60 = vpop.trf.xlu1 }
 0x34e   : > { %1607 = vmatprep.mubr.msk.bf16.mxu1 %vm511_vm1, %v509_v55 }
 0x351   : > { %v510_v57 = vpop.trf.xlu0  ;;  %v647_v61 = vpop.trf.xlu1 }
 0x352   : > { %1608 = vmatmul.mubr.msk.bf16.gmra.mrb[8].mxu1 %vm511_vm1, %v510_v57 }
 0x353   : > { %1613 = vmatprep.mubr.msk.bf16.mxu1 %vm511_vm1, %v641_v54 }
 0x355   : > { %v648_v62 = vpop.trf.xlu1 }
 0x35a   : > { %1614 = vmatmul.mubr.msk.bf16.vlgmr.msra.gmra.mrb[12].mxu1 %vm511_vm1, %v642_v56 }
 0x35b   : > { %1617 = vmatprep.mubr.msk.bf16.mxu1 %vm511_vm1, %v643_v58 }
 0x362   : > { %1618 = vmatmul.mubr.msk.bf16.gmra.mrb[16].mxu1 %vm511_vm1, %v644_v5 }
 0x363   : > { %1621 = vmatprep.mubr.msk.bf16.mxu1 %vm511_vm1, %v645_v59 }
 0x36a   : > { %1622 = vmatmul.mubr.msk.bf16.gmra.mrb[20].mxu1 %vm511_vm1, %v646_v60 }
 0x36b   : > { %1625 = vmatprep.mubr.msk.bf16.mxu1 %vm511_vm1, %v647_v61 }
 0x372   : > { %1626 = vmatmul.mubr.msk.bf16.gmra.mrb[24].mxu1 %vm511_vm1, %v648_v62 }
 0x40d   : > { %v1597_v63 = vpop.f32.mrb[4].mxu0 }
 0x40e   : > { %v790_v0 = vmul.f32 %v1597_v63, %v1597_v63  ;;  %v570_v1 = vpop.f32.mrb[5].mxu0 }
 0x40f   : > { %v1598_v2 = vpop.f32.mrb[6].mxu0  ;;  %v788_v6 = vmul.f32 %v570_v1, %v570_v1 }
 0x410   : > { %824 = vadd.xlane.f32.xlu0 %v790_v0  ;;  %v573_v3 = vpop.f32.mrb[7].mxu0  ;;  %v791_v8 = vmul.f32 %v1598_v2, %v1598_v2 }
 0x411   : > { %v789_v4 = vmul.f32 %v573_v3, %v573_v3 }
 0x413   : > { %822 = vadd.xlane.f32.xlu1 %v789_v4 }
 0x414   : > { %820 = vadd.xlane.f32.xlu0 %v788_v6 }
 0x415   : > { %v1601_v7 = vpop.f32.mrb[0].mxu1 }
 0x416   : > { %v586_v9 = vpop.f32.mrb[1].mxu1  ;;  %v794_v18 = vmul.f32 %v1601_v7, %v1601_v7 }
 0x417   : > { %v1602_v12 = vpop.f32.mrb[2].mxu1  ;;  %v792_v21 = vmul.f32 %v586_v9, %v586_v9 }
 0x418   : > { %826 = vadd.xlane.f32.xlu0 %v791_v8  ;;  %v589_v16 = vpop.f32.mrb[3].mxu1  ;;  %v795_v25 = vmul.f32 %v1602_v12, %v1602_v12 }
 0x419   : > { %v793_v27 = vmul.f32 %v589_v16, %v589_v16  ;;  %v2204_v16 = vshrl.u32 %v275_v10, 7  ;;  %v1205_v10 = vadd.s32 4294967264, %v2138_v11 }
 0x41c   : > { %832 = vadd.xlane.f32.xlu0 %v794_v18  ;;  %v1191_v18 = vadd.s32 4294967280, %v2138_v11 }
 0x41d   : > { %v1605_v20 = vpop.f32.mrb[4].mxu1 }
 0x41e   : > { %v602_v22 = vpop.f32.mrb[5].mxu1  ;;  %v798_v31 = vmul.f32 %v1605_v20, %v1605_v20  ;;  %v1184_v20 = vadd.s32 4294967288, %v2138_v11 }
 0x41f   : > { %v1606_v23 = vpop.f32.mrb[6].mxu1  ;;  %v796_v33 = vmul.f32 %v602_v22, %v602_v22 }
 0x420   : > { %828 = vadd.xlane.f32.xlu0 %v792_v21  ;;  %v605_v24 = vpop.f32.mrb[7].mxu1  ;;  %v799_v38 = vmul.f32 %v1606_v23, %v1606_v23  ;;  %v1198_v23 = vadd.s32 4294967272, %v2138_v11 }
 0x421   : > { %v797_v41 = vmul.f32 %v605_v24, %v605_v24  ;;  %v1219_v24 = vadd.s32 4294967248, %v2138_v11 }
 0x424   : > { %834 = vadd.xlane.f32.xlu0 %v795_v25 }
 0x425   : > { %v1609_v26 = vpop.f32.mrb[8].mxu1 }
 0x426   : > { %v618_v28 = vpop.f32.mrb[9].mxu1  ;;  %v802_v55 = vmul.f32 %v1609_v26, %v1609_v26  ;;  %v775_v26 = vrot.slane %v2167_v45, 4 }
 0x427   : > { %v1610_v29 = vpop.f32.mrb[10].mxu1  ;;  %v800_v50 = vmul.f32 %v618_v28, %v618_v28  ;;  %v782_v28 = vrot.slane %v2171_v51, 4 }
 0x428   : > { %830 = vadd.xlane.f32.xlu0 %v793_v27  ;;  %v621_v30 = vpop.f32.mrb[11].mxu1  ;;  %v803_v60 = vmul.f32 %v1610_v29, %v1610_v29  ;;  %v1226_v27 = vadd.s32 4294967240, %v2138_v11  ;;  %v2219_v29 = vsub.s32 %v1191_v18, %v2204_v16 }
 0x429   : > { %v801_v14 = vmul.f32 %v621_v30, %v621_v30  ;;  %v1212_v30 = vadd.s32 4294967256, %v2138_v11 }
 0x42c   : > { %840 = vadd.xlane.f32.xlu0 %v798_v31  ;;  %v1247_v31 = vadd.s32 4294967216, %v2138_v11 }
 0x42d   : > { %v1615_v32 = vpop.f32.mrb[12].mxu1 }
 0x42e   : > { %v806_v34 = vmul.f32 %v1615_v32, %v1615_v32  ;;  %v707_v35 = vpop.f32.mrb[13].mxu1  ;;  %v2224_v32 = vsub.s32 %v1184_v20, %v2204_v16 }
 0x42f   : > { %v1616_v36 = vpop.f32.mrb[14].mxu1  ;;  %v804_v48 = vmul.f32 %v707_v35, %v707_v35 }
 0x430   : > { %836 = vadd.xlane.f32.xlu0 %v796_v33  ;;  %856 = vadd.xlane.f32.xlu1 %v806_v34  ;;  %v710_v37 = vpop.f32.mrb[15].mxu1  ;;  %v807_v39 = vmul.f32 %v1616_v36, %v1616_v36  ;;  %v2228_v34 = vsub.s32 %v2138_v11, %v2204_v16  ;;  %v1233_v36 = vadd.s32 4294967232, %v2138_v11 }
 0x431   : > { %v805_v42 = vmul.f32 %v710_v37, %v710_v37 }
 0x434   : > { %842 = vadd.xlane.f32.xlu0 %v799_v38  ;;  %858 = vadd.xlane.f32.xlu1 %v807_v39  ;;  %v2235_v39 = vsub.s32 %v1198_v23, %v2204_v16 }
 0x435   : > { %v1619_v40 = vpop.f32.mrb[16].mxu1 }
 0x436   : > { %v723_v43 = vpop.f32.mrb[17].mxu1  ;;  %v810_v46 = vmul.f32 %v1619_v40, %v1619_v40  ;;  %v2238_v40 = vsub.s32 %v1219_v24, %v2204_v16 }
 0x437   : > { %v1620_v44 = vpop.f32.mrb[18].mxu1  ;;  %v808_v52 = vmul.f32 %v723_v43, %v723_v43  ;;  %v2245_v43 = vsub.s32 %v1226_v27, %v2204_v16 }
 0x438   : > { %838 = vadd.xlane.f32.xlu0 %v797_v41  ;;  %854 = vadd.xlane.f32.xlu1 %v805_v42  ;;  %v726_v47 = vpop.f32.mrb[19].mxu1  ;;  %v811_v17 = vmul.f32 %v1620_v44, %v1620_v44  ;;  %v2242_v42 = vsub.s32 %v1205_v10, %v2204_v16  ;;  %v1254_v44 = vadd.s32 4294967208, %v2138_v11 }
 0x439   : > { %v809_v56 = vmul.f32 %v726_v47, %v726_v47  ;;  %v2251_v47 = vsub.s32 %v1212_v30, %v2204_v16 }
 0x43c   : > { %852 = vadd.xlane.f32.xlu0 %v804_v48  ;;  %864 = vadd.xlane.f32.xlu1 %v810_v46  ;;  %v1240_v46 = vadd.s32 4294967224, %v2138_v11  ;;  %v2254_v48 = vsub.s32 %v1247_v31, %v2204_v16 }
 0x43d   : > { %v1623_v49 = vpop.f32.mrb[20].mxu1 }
 0x43e   : > { %v739_v15 = vpop.f32.mrb[21].mxu1  ;;  %v814_v5 = vmul.f32 %v1623_v49, %v1623_v49 }
 0x43f   : > { %v1624_v19 = vpop.f32.mrb[22].mxu1  ;;  %v812_v61 = vmul.f32 %v739_v15, %v739_v15  ;;  %v2261_v15 = vsub.s32 %v1233_v36, %v2204_v16 }
 0x440   : > { %844 = vadd.xlane.f32.xlu0 %v800_v50  ;;  %860 = vadd.xlane.f32.xlu1 %v808_v52  ;;  %v742_v53 = vpop.f32.mrb[23].mxu1  ;;  %v815_v62 = vmul.f32 %v1624_v19, %v1624_v19 }
 0x441   : > { %v813_v63 = vmul.f32 %v742_v53, %v742_v53 }
 0x444   : > { %846 = vadd.xlane.f32.xlu0 %v801_v14  ;;  %866 = vadd.xlane.f32.xlu1 %v811_v17  ;;  %v1261_v17 = vadd.s32 4294967200, %v2138_v11 }
 0x445   : > { %v1627_v54 = vpop.f32.mrb[24].mxu1 }
 0x446   : > { %v755_v57 = vpop.f32.mrb[25].mxu1  ;;  %v818_v0 = vmul.f32 %v1627_v54, %v1627_v54 }
 0x447   : > { %v1628_v58 = vpop.f32.mrb[26].mxu1  ;;  %v816_v1 = vmul.f32 %v755_v57, %v755_v57 }
 0x448   : > { %848 = vadd.xlane.f32.xlu0 %v802_v55  ;;  %862 = vadd.xlane.f32.xlu1 %v809_v56  ;;  %v758_v59 = vpop.f32.mrb[27].mxu1  ;;  %v819_v3 = vmul.f32 %v1628_v58, %v1628_v58  ;;  %v2268_v55 = vsub.s32 %v1254_v44, %v2204_v16  ;;  %v2271_v56 = vsub.s32 %v1240_v46, %v2204_v16 }
 0x449   : > { %v817_v2 = vmul.f32 %v758_v59, %v758_v59 }
 0x44c   : > { %850 = vadd.xlane.f32.xlu0 %v803_v60  ;;  %872 = vadd.xlane.f32.xlu1 %v814_v5  ;;  %v1268_v5 = vadd.s32 4294967192, %v2138_v11 }
 0x44e   : > { %v2301_v27 = vsub.s32 %v1268_v5, %v2204_v16 }
 0x450   : > { %868 = vadd.xlane.f32.xlu1 %v812_v61 }
 0x454   : > { %874 = vadd.xlane.f32.xlu1 %v815_v62 }
 0x458   : > { %870 = vadd.xlane.f32.xlu1 %v813_v63 }
 0x45c   : > { %880 = vadd.xlane.f32.xlu1 %v818_v0  ;;  %v1282_v0 = vadd.s32 4294967176, %v2138_v11 }
 0x45e   : > { %v2304_v30 = vsub.s32 %v1282_v0, %v2204_v16 }
 0x460   : > { %876 = vadd.xlane.f32.xlu1 %v816_v1 }
 0x464   : > { %878 = vadd.xlane.f32.xlu1 %v817_v2 }
 0x468   : > { %882 = vadd.xlane.f32.xlu1 %v819_v3  ;;  %v2288_v3 = vsub.s32 %v1261_v17, %v2204_v16 }
 0x49d   : > { %v2190_v4 = vpop.xlane.xlu0 %824 }
 0x49e   : > { %vm900_vm5 = vcmp.eq.f32.partialorder %v2190_v4, inf  ;;  %vm902_vm9 = vcmp.eq.f32.partialorder %v2190_v4, 0.0  ;;  %v903_v1 = vand.u32 2147483648, %v2190_v4 }
 0x4a0   : > { %v823_v7 = vpop.xlane.xlu1 %822 }
 0x4a1   : > { %v2192_v6 = vpop.xlane.xlu0 %820  ;;  %1739 = vrsqrt.f32 %v823_v7  ;;  %vm893_vm2 = vcmp.eq.f32.partialorder %v823_v7, inf  ;;  %v896_v19 = vand.u32 2147483648, %v823_v7  ;;  %vm895_vm4 = vcmp.eq.f32.partialorder %v823_v7, 0.0 }
 0x4a2   : > { %1741 = vrsqrt.f32 %v2192_v6  ;;  %vm886_vm3 = vcmp.eq.f32.partialorder %v2192_v6, inf  ;;  %v889_v54 = vand.u32 2147483648, %v2192_v6  ;;  %vm888_vm6 = vcmp.eq.f32.partialorder %v2192_v6, 0.0 }
 0x4a3   : > { %1743 = vrsqrt.f32 %v2190_v4 }
 0x4a5   : > { %v2194_v8 = vpop.xlane.xlu0 %826 }
 0x4a6   : > { %1745 = vrsqrt.f32 %v2194_v8  ;;  %vm907_vm8 = vcmp.eq.f32.partialorder %v2194_v8, inf  ;;  %vm909_vm11 = vcmp.eq.f32.partialorder %v2194_v8, 0.0 }
 0x4a9   : > { %v2197_v9 = vpop.xlane.xlu0 %832 }
 0x4aa   : > { %vm928_vm13 = vcmp.eq.f32.partialorder %v2197_v9, inf }
 0x4ab   : > { %v1740_v22 = vpop.eup %1739 }
 0x4ac   : > { %v1742_v25 = vpop.eup %1741  ;;  %v892_v33 = vmul.f32 %v1740_v22, %v823_v7 }
 0x4ad   : > { %v2201_v12 = vpop.xlane.xlu0 %828  ;;  %v1744_v37 = vpop.eup %1743  ;;  %v885_v38 = vmul.f32 %v1742_v25, %v2192_v6 }
 0x4ae   : > { %1747 = vrsqrt.f32 %v2201_v12  ;;  %v899_v49 = vmul.f32 %v1744_v37, %v2190_v4  ;;  %v894_v50 = vsel %vm893_vm2, %v823_v7, %v892_v33  ;;  %v910_v7 = vand.u32 2147483648, %v2194_v8 }
 0x4af   : > { %1749 = vrsqrt.f32 %v2197_v9  ;;  %v887_v53 = vsel %vm886_vm3, %v2192_v6, %v885_v38  ;;  %v897_v58 = vsel %vm895_vm4, %v896_v19, %v894_v50  ;;  %vm914_vm14 = vcmp.eq.f32.partialorder %v2201_v12, inf }
 0x4b0   : > { %v1746_v41 = vpop.eup %1745  ;;  %v901_v60 = vsel %vm900_vm5, %v2190_v4, %v899_v49  ;;  %v890_v61 = vsel %vm888_vm6, %v889_v54, %v887_v53  ;;  %v1111_v6 = vmax.f32 %v897_v58, 1e-08  ;;  %v1275_v33 = vadd.s32 4294967184, %v2138_v11 }
 0x4b1   : > { %v2208_v21 = vpop.xlane.xlu0 %834  ;;  %v906_v14 = vmul.f32 %v1746_v41, %v2194_v8  ;;  %v904_v22 = vsel %vm902_vm9, %v903_v1, %v901_v60  ;;  %v1110_v23 = vmax.f32 %v890_v61, 1e-08  ;;  %v917_v41 = vand.u32 2147483648, %v2201_v12 }
 0x4b2   : > { %v1112_v36 = vmax.f32 %v904_v22, 1e-08  ;;  %v1188_v37 = vrot.slane %v1111_v6, %v2224_v32  ;;  %v931_v50 = vand.u32 2147483648, %v2197_v9  ;;  %vm916_vm15 = vcmp.eq.f32.partialorder %v2201_v12, 0.0 }
 0x4b3   : > { %v908_v2 = vsel %vm907_vm8, %v2194_v8, %v906_v14  ;;  %v1183_v44 = vrot.slane %v1110_v23, %v2228_v34  ;;  %vm930_vm2 = vcmp.eq.f32.partialorder %v2197_v9, 0.0  ;;  %vm2706_vm3 = vcmask 326912  }
 0x4b4   : > { %v911_v24 = vsel %vm909_vm11, %v910_v7, %v908_v2  ;;  %vm935_vm4 = vcmp.eq.f32.partialorder %v2208_v21, inf  ;;  %vm2707_vm6 = vcmask 392512   ;;  %v938_v7 = vand.u32 2147483648, %v2208_v21 }
 0x4b5   : > { %v2230_v35 = vpop.xlane.xlu0 %830  ;;  %v1113_v46 = vmax.f32 %v911_v24, 1e-08  ;;  %v1190_v58 = vsel %vm1189_vm7, %v1188_v37, %v1183_v44  ;;  %vm937_vm8 = vcmp.eq.f32.partialorder %v2208_v21, 0.0  ;;  %vm1224_vm9 = vcmask 458112  }
 0x4b6   : > { %1751 = vrsqrt.f32 %v2230_v35  ;;  %vm921_vm1 = vcmp.eq.f32.partialorder %v2230_v35, inf  ;;  %vm923_vm5 = vcmp.eq.f32.partialorder %v2230_v35, 0.0 }
 0x4b7   : > { %1753 = vrsqrt.f32 %v2208_v21  ;;  %v1202_v5 = vrot.slane %v1113_v46, %v2235_v39 }
 0x4b8   : > { %v1748_v57 = vpop.eup %1747 }
 0x4b9   : > { %v2258_v52 = vpop.xlane.xlu0 %840  ;;  %v1750_v59 = vpop.eup %1749  ;;  %v913_v18 = vmul.f32 %v1748_v57, %v2201_v12  ;;  %v924_v57 = vand.u32 2147483648, %v2230_v35 }
 0x4ba   : > { %1755 = vrsqrt.f32 %v2258_v52  ;;  %v927_v4 = vmul.f32 %v1750_v59, %v2197_v9  ;;  %vm956_vm11 = vcmp.eq.f32.partialorder %v2258_v52, inf }
 0x4bb   : > { %v915_v38 = vsel %vm914_vm14, %v2201_v12, %v913_v18  ;;  %v1195_v12 = vrot.slane %v1112_v36, %v2219_v29  ;;  %v2354_v18 = vsub.s32 %v1275_v33, %v2204_v16 }
 0x4bc   : > { %v929_v49 = vsel %vm928_vm13, %v2197_v9, %v927_v4  ;;  %v918_v14 = vsel %vm916_vm15, %v917_v41, %v915_v38  ;;  %v2343_v9 = vld [vmem:[%s244_s20] sm:$0x1]  ;;  %vm958_vm13 = vcmp.eq.f32.partialorder %v2258_v52, 0.0  ;;  %v959_v38 = vand.u32 2147483648, %v2258_v52 }
 0x4bd   : > { %v2278_v62 = vpop.xlane.xlu1 %856  ;;  %v2280_v63 = vpop.xlane.xlu0 %836  ;;  %v932_v54 = vsel %vm930_vm2, %v931_v50, %v929_v49  ;;  %v1114_v60 = vmax.f32 %v918_v14, 1e-08  ;;  %v1197_v22 = vsel %vm1196_vm10, %v1195_v12, %v1190_v58  ;;  %v1109_v23 = vmax.f32 %v2343_v9, 1e-08 }
 0x4be   : > { %1757 = vrsqrt.f32 %v2280_v63  ;;  %v1116_v6 = vmax.f32 %v932_v54, 1e-08  ;;  %vm1012_vm14 = vcmp.eq.f32.partialorder %v2278_v62, inf  ;;  %vm1014_vm15 = vcmp.eq.f32.partialorder %v2278_v62, 0.0 }
 0x4bf   : > { %1759 = vrsqrt.f32 %v2278_v62  ;;  %v1209_v33 = vrot.slane %v1114_v60, %v2242_v42  ;;  %v1015_v46 = vand.u32 2147483648, %v2278_v62  ;;  %vm944_vm2 = vcmp.eq.f32.partialorder %v2280_v63, 0.0 }
 0x4c0   : > { %v1752_v20 = vpop.eup %1751  ;;  %v1223_v37 = vrot.slane %v1116_v6, %v2238_v40  ;;  %v945_v12 = vand.u32 2147483648, %v2280_v63 }
 0x4c1   : > { %v2296_v25 = vpop.xlane.xlu1 %858  ;;  %v2298_v10 = vpop.xlane.xlu0 %842  ;;  %v920_v8 = vmul.f32 %v1752_v20, %v2230_v35 }
 0x4c2   : > { %v1754_v31 = vpop.eup %1753  ;;  %1761 = vrsqrt.f32 %v2296_v25 }
 0x4c3   : > { %v934_v11 = vmul.f32 %v1754_v31, %v2208_v21  ;;  %v922_v17 = vsel %vm921_vm1, %v2230_v35, %v920_v8  ;;  %1763 = vrsqrt.f32 %v2298_v10  ;;  %v1145_v35 = vsub.s32 0, %v2204_v16 }
 0x4c4   : > { %v1756_v59 = vpop.eup %1755  ;;  %v925_v0 = vsel %vm923_vm5, %v924_v57, %v922_v17  ;;  %v1204_v8 = vsel %vm2708_vm12, %v1202_v5, %v1197_v22  ;;  %vm942_vm1 = vcmp.eq.f32.partialorder %v2280_v63, inf  ;;  %vm1019_vm5 = vcmp.eq.f32.partialorder %v2296_v25, inf }
 0x4c5   : > { %v2325_v19 = vpop.xlane.xlu1 %854  ;;  %v2327_v53 = vpop.xlane.xlu0 %838  ;;  %v936_v61 = vsel %vm935_vm4, %v2208_v21, %v934_v11  ;;  %v1115_v24 = vmax.f32 %v925_v0, 1e-08  ;;  %v955_v31 = vmul.f32 %v1756_v59, %v2258_v52  ;;  %v1211_v14 = vsel %vm2706_vm3, %v1209_v33, %v1204_v8 }
 0x4c6   : > { %1765 = vrsqrt.f32 %v2325_v19  ;;  %v939_v4 = vsel %vm937_vm8, %v938_v7, %v936_v61  ;;  %vm1231_vm4 = vcmask 523712   ;;  %vm1021_vm8 = vcmp.eq.f32.partialorder %v2296_v25, 0.0 }
 0x4c7   : > { %1767 = vrsqrt.f32 %v2327_v53  ;;  %v1117_v44 = vmax.f32 %v939_v4, 1e-08  ;;  %v1216_v50 = vrot.slane %v1115_v24, %v2251_v47  ;;  %v957_v11 = vsel %vm956_vm11, %v2258_v52, %v955_v31 }
 0x4c8   : > { %v1758_v20 = vpop.eup %1757  ;;  %v1022_v5 = vand.u32 2147483648, %v2296_v25  ;;  %v960_v61 = vsel %vm958_vm13, %v959_v38, %v957_v11  ;;  %vm963_vm11 = vcmp.eq.f32.partialorder %v2298_v10, inf  ;;  %v966_v7 = vand.u32 2147483648, %v2298_v10 }
 0x4c9   : > { %v2347_v1 = vpop.xlane.xlu1 %864  ;;  %v2349_v2 = vpop.xlane.xlu0 %852  ;;  %v941_v41 = vmul.f32 %v1758_v20, %v2280_v63  ;;  %v1230_v60 = vrot.slane %v1117_v44, %v2245_v43  ;;  %v1218_v6 = vsel %vm2707_vm6, %v1216_v50, %v1211_v14  ;;  %vm1005_vm3 = vcmp.eq.f32.partialorder %v2325_v19, inf }
 0x4ca   : > { %1769 = vrsqrt.f32 %v2349_v2  ;;  %v1760_v36 = vpop.eup %1759  ;;  %vm1007_vm13 = vcmp.eq.f32.partialorder %v2325_v19, 0.0  ;;  %v1120_v33 = vmax.f32 %v960_v61, 1e-08  ;;  %vm1238_vm6 = vcmask 589312  }
 0x4cb   : > { %v1011_v17 = vmul.f32 %v1760_v36, %v2278_v62  ;;  %v943_v58 = vsel %vm942_vm1, %v2280_v63, %v941_v41  ;;  %vm965_vm1 = vcmp.eq.f32.partialorder %v2298_v10, 0.0  ;;  %v1008_v38 = vand.u32 2147483648, %v2325_v19 }
 0x4cc   : > { %v1762_v49 = vpop.eup %1761  ;;  %v946_v4 = vsel %vm944_vm2, %v945_v12, %v943_v58  ;;  %vm949_vm12 = vcmp.eq.f32.partialorder %v2327_v53, inf  ;;  %v1225_v41 = vsel %vm1224_vm9, %v1223_v37, %v1218_v6  ;;  %vm998_vm2 = vcmp.eq.f32.partialorder %v2349_v2, inf }
 0x4cd   : > { %v2366_v21 = vpop.xlane.xlu1 %860  ;;  %v1764_v57 = vpop.eup %1763  ;;  %v1018_v0 = vmul.f32 %v1762_v49, %v2296_v25  ;;  %v1013_v52 = vsel %vm1012_vm14, %v2278_v62, %v1011_v17  ;;  %vm951_vm14 = vcmp.eq.f32.partialorder %v2327_v53, 0.0  ;;  %v1118_v50 = vmax.f32 %v946_v4, 1e-08 }
 0x4ce   : > { %1771 = vrsqrt.f32 %v2366_v21  ;;  %v2398_v20 = vpop.xlane.xlu0 %844  ;;  %v962_v24 = vmul.f32 %v1764_v57, %v2298_v10  ;;  %v1016_v49 = vsel %vm1014_vm15, %v1015_v46, %v1013_v52  ;;  %v1001_v11 = vand.u32 2147483648, %v2349_v2 }
 0x4cf   : > { %1773 = vrsqrt.f32 %v2347_v1  ;;  %v1020_v63 = vsel %vm1019_vm5, %v2296_v25, %v1018_v0  ;;  %vm1000_vm15 = vcmp.eq.f32.partialorder %v2349_v2, 0.0  ;;  %v952_v61 = vand.u32 2147483648, %v2327_v53 }
 0x4d0   : > { %v1766_v59 = vpop.eup %1765  ;;  %1775 = vrsqrt.f32 %v2398_v20  ;;  %v964_v37 = vsel %vm963_vm11, %v2298_v10, %v962_v24  ;;  %v1023_v62 = vsel %vm1021_vm8, %v1022_v5, %v1020_v63  ;;  %vm1040_vm5 = vcmp.eq.f32.partialorder %v2347_v1, inf }
 0x4d1   : > { %v2383_v54 = vpop.xlane.xlu1 %866  ;;  %v1768_v22 = vpop.eup %1767  ;;  %v1004_v36 = vmul.f32 %v1766_v59, %v2325_v19  ;;  %v1128_v59 = vmax.f32 %v1016_v49, 1e-08  ;;  %v2443_v25 = vrot.slane %v1120_v33, %v2254_v48  ;;  %v1232_v5 = vsel %vm1231_vm4, %v1230_v60, %v1225_v41 }
 0x4d2   : > { %v948_v17 = vmul.f32 %v1768_v22, %v2327_v53  ;;  %v2440_v6 = vpop.xlane.xlu0 %846  ;;  %v967_v22 = vsel %vm965_vm1, %v966_v7, %v964_v37  ;;  %v1237_v52 = vrot.slane %v1118_v50, %v2261_v15  ;;  %v1129_v4 = vmax.f32 %v1023_v62, 1e-08 }
 0x4d3   : > { %v1006_v46 = vsel %vm1005_vm3, %v2325_v19, %v1004_v36  ;;  %vm1042_vm3 = vcmp.eq.f32.partialorder %v2347_v1, 0.0  ;;  %v1301_v60 = vrot.slane %v1128_v59, %v2219_v29  ;;  %v1121_v7 = vmax.f32 %v967_v22, 1e-08 }
 0x4d4   : > { %v1770_v8 = vpop.eup %1769  ;;  %v1009_v24 = vsel %vm1007_vm13, %v1008_v38, %v1006_v46  ;;  %v1043_v41 = vand.u32 2147483648, %v2347_v1  ;;  %vm1026_vm8 = vcmp.eq.f32.partialorder %v2366_v21, inf  ;;  %v1239_v49 = vsel %vm1238_vm6, %v1237_v52, %v1232_v5 }
 0x4d5   : > { %v2407_v31 = vpop.xlane.xlu1 %862  ;;  %v997_v44 = vmul.f32 %v1770_v8, %v2349_v2  ;;  %v950_v8 = vsel %vm949_vm12, %v2327_v53, %v948_v17  ;;  %v1127_v19 = vmax.f32 %v1009_v24, 1e-08  ;;  %vm1028_vm12 = vcmp.eq.f32.partialorder %v2366_v21, 0.0 }
 0x4d6   : > { %1777 = vrsqrt.f32 %v2407_v31  ;;  %v953_v38 = vsel %vm951_vm14, %v952_v61, %v950_v8  ;;  %v1306_v50 = vrot.slane %v1129_v4, %v2235_v39  ;;  %vm1245_vm11 = vcmask 654912  }
 0x4d7   : > { %v999_v12 = vsel %vm998_vm2, %v2349_v2, %v997_v44  ;;  %1779 = vrsqrt.f32 %v2383_v54  ;;  %v1029_v29 = vand.u32 2147483648, %v2366_v21  ;;  %vm970_vm1 = vcmp.eq.f32.partialorder %v2398_v20, inf }
 0x4d8   : > { %v1772_v14 = vpop.eup %1771  ;;  %v1002_v0 = vsel %vm1000_vm15, %v1001_v11, %v999_v12  ;;  %1781 = vrsqrt.f32 %v2440_v6  ;;  %v2471_v11 = vpop.xlane.xlu0 %848  ;;  %vm972_vm13 = vcmp.eq.f32.partialorder %v2398_v20, 0.0  ;;  %v2482_v17 = vrot.slane %v1121_v7, %v2268_v55 }
 0x4d9   : > { %v2429_v57 = vpop.xlane.xlu1 %872  ;;  %v1774_v58 = vpop.eup %1773  ;;  %v1025_v2 = vmul.f32 %v1772_v14, %v2366_v21  ;;  %v1126_v10 = vmax.f32 %v1002_v0, 1e-08  ;;  %v1119_v12 = vmax.f32 %v953_v38, 1e-08  ;;  %v973_v0 = vand.u32 2147483648, %v2398_v20 }
 0x4da   : > { %v1039_v33 = vmul.f32 %v1774_v58, %v2347_v1  ;;  %v1776_v44 = vpop.eup %1775  ;;  %1783 = vrsqrt.f32 %v2429_v57  ;;  %v1296_v58 = vrot.slane %v1127_v19, %v2224_v32  ;;  %vm1047_vm14 = vcmp.eq.f32.partialorder %v2383_v54, inf }
 0x4db   : > { %v1027_v63 = vsel %vm1026_vm8, %v2366_v21, %v1025_v2  ;;  %v1292_v37 = vrot.slane %v1126_v10, %v2228_v34  ;;  %v969_v59 = vmul.f32 %v1776_v44, %v2398_v20  ;;  %vm1049_vm2 = vcmp.eq.f32.partialorder %v2383_v54, 0.0 }
 0x4dc   : > { %v1041_v53 = vsel %vm1040_vm5, %v2347_v1, %v1039_v33  ;;  %v1030_v62 = vsel %vm1028_vm12, %v1029_v29, %v1027_v63  ;;  %vm1033_vm15 = vcmp.eq.f32.partialorder %v2407_v31, inf  ;;  %v1050_v1 = vand.u32 2147483648, %v2383_v54  ;;  %v2504_v52 = vpop.xlane.xlu0 %850 }
 0x4dd   : > { %v2455_v36 = vpop.xlane.xlu1 %868  ;;  %v1044_v61 = vsel %vm1042_vm3, %v1043_v41, %v1041_v53  ;;  %v1297_v5 = vsel %vm1189_vm7, %v1296_v58, %v1292_v37  ;;  %v1130_v32 = vmax.f32 %v1030_v62, 1e-08  ;;  %v1244_v24 = vrot.slane %v1119_v12, %v2271_v56 }
 0x4de   : > { %1785 = vrsqrt.f32 %v2455_v36  ;;  %v1132_v8 = vmax.f32 %v1044_v61, 1e-08  ;;  %v971_v33 = vsel %vm970_vm1, %v2398_v20, %v969_v59  ;;  %v1036_v10 = vand.u32 2147483648, %v2407_v31 }
 0x4df   : > { %1787 = vrsqrt.f32 %v2471_v11  ;;  %v1302_v7 = vsel %vm1196_vm10, %v1301_v60, %v1297_v5  ;;  %vm977_vm7 = vcmp.eq.f32.partialorder %v2440_v6, inf  ;;  %vm979_vm5 = vcmp.eq.f32.partialorder %v2440_v6, 0.0 }
 0x4e0   : > { %v1778_v39 = vpop.eup %1777  ;;  %vm1035_vm3 = vcmp.eq.f32.partialorder %v2407_v31, 0.0  ;;  %v1311_v19 = vrot.slane %v1130_v32, %v2242_v42  ;;  %v980_v38 = vand.u32 2147483648, %v2440_v6  ;;  %v974_v44 = vsel %vm972_vm13, %v973_v0, %v971_v33 }
 0x4e1   : > { %v2473_v14 = vpop.xlane.xlu1 %874  ;;  %v1780_v46 = vpop.eup %1779  ;;  %v1032_v34 = vmul.f32 %v1778_v39, %v2407_v31  ;;  %v2529_v53 = vsel %vm1245_vm11, %v1244_v24, %v1239_v49  ;;  %v2532_v42 = vrot.slane %v1132_v8, %v2238_v40  ;;  %vm2719_vm10 = vcmask 261312  }
 0x4e2   : > { %1789 = vrsqrt.f32 %v2473_v14  ;;  %v1046_v22 = vmul.f32 %v1780_v46, %v2383_v54  ;;  %v1782_v4 = vpop.eup %1781  ;;  %v1307_v37 = vsel %vm2719_vm10, %v1306_v50, %v1302_v7  ;;  %vm984_vm8 = vcmp.eq.f32.partialorder %v2471_v11, inf }
 0x4e3   : > { %v1034_v2 = vsel %vm1033_vm15, %v2407_v31, %v1032_v34  ;;  %v976_v29 = vmul.f32 %v1782_v4, %v2440_v6  ;;  %v987_v12 = vand.u32 2147483648, %v2471_v11  ;;  %vm1068_vm12 = vcmp.eq.f32.partialorder %v2429_v57, inf }
 0x4e4   : > { %v1037_v63 = vsel %vm1035_vm3, %v1036_v10, %v1034_v2  ;;  %v1048_v60 = vsel %vm1047_vm14, %v2383_v54, %v1046_v22  ;;  %v1784_v31 = vpop.eup %1783  ;;  %v1071_v62 = vand.u32 2147483648, %v2429_v57  ;;  %v1122_v49 = vmax.f32 %v974_v44, 1e-08 }
 0x4e5   : > { %v2496_v21 = vpop.xlane.xlu1 %870  ;;  %v1131_v39 = vmax.f32 %v1037_v63, 1e-08  ;;  %v1051_v40 = vsel %vm1049_vm2, %v1050_v1, %v1048_v60  ;;  %vm1070_vm1 = vcmp.eq.f32.partialorder %v2429_v57, 0.0  ;;  %vm2720_vm13 = vcmask 326912  }
 0x4e6   : > { %1791 = vrsqrt.f32 %v2496_v21  ;;  %v1312_v59 = vsel %vm2720_vm13, %v1311_v19, %v1307_v37  ;;  %v978_v34 = vsel %vm977_vm7, %v2440_v6, %v976_v29  ;;  %vm986_vm14 = vcmp.eq.f32.partialorder %v2471_v11, 0.0 }
 0x4e7   : > { %1793 = vrsqrt.f32 %v2504_v52  ;;  %vm1054_vm15 = vcmp.eq.f32.partialorder %v2455_v36, inf  ;;  %v1057_v61 = vand.u32 2147483648, %v2455_v36  ;;  %v1067_v0 = vmul.f32 %v1784_v31, %v2429_v57 }
 0x4e8   : > { %v1786_v20 = vpop.eup %1785  ;;  %v994_v5 = vand.u32 2147483648, %v2504_v52  ;;  %vm1056_vm2 = vcmp.eq.f32.partialorder %v2455_v36, 0.0  ;;  %v1133_v1 = vmax.f32 %v1051_v40, 1e-08  ;;  %v1316_v2 = vrot.slane %v1131_v39, %v2251_v47 }
 0x4e9   : > { %v2516_v41 = vpop.xlane.xlu1 %880  ;;  %v1788_v58 = vpop.eup %1787  ;;  %v1053_v50 = vmul.f32 %v1786_v20, %v2455_v36  ;;  %v2562_v33 = vrot.slane %v1122_v49, %v2288_v3  ;;  %v2566_v10 = vsel %vm979_vm5, %v980_v38, %v978_v34  ;;  %vm991_vm7 = vcmp.eq.f32.partialorder %v2504_v52, inf }
 0x4ea   : > { %1795 = vrsqrt.f32 %v2516_v41  ;;  %v983_v4 = vmul.f32 %v1788_v58, %v2471_v11  ;;  %vm1075_vm3 = vcmp.eq.f32.partialorder %v2473_v14, inf  ;;  %vm1061_vm10 = vcmp.eq.f32.partialorder %v2496_v21, inf }
 0x4eb   : > { %v1055_v32 = vsel %vm1054_vm15, %v2455_v36, %v1053_v50  ;;  %v1064_v7 = vand.u32 2147483648, %v2496_v21  ;;  %v1069_v6 = vsel %vm1068_vm12, %v2429_v57, %v1067_v0  ;;  %vm1063_vm5 = vcmp.eq.f32.partialorder %v2496_v21, 0.0 }
 0x4ec   : > { %v1790_v54 = vpop.eup %1789  ;;  %v1058_v24 = vsel %vm1056_vm2, %v1057_v61, %v1055_v32  ;;  %v1326_v60 = vrot.slane %v1133_v1, %v2245_v43  ;;  %vm2721_vm13 = vcmask 392512   ;;  %v985_v31 = vsel %vm984_vm8, %v2471_v11, %v983_v4 }
 0x4ed   : > { %v2539_v46 = vpop.xlane.xlu1 %876  ;;  %v1074_v47 = vmul.f32 %v1790_v54, %v2473_v14  ;;  %v1134_v38 = vmax.f32 %v1058_v24, 1e-08  ;;  %v1317_v29 = vsel %vm2721_vm13, %v1316_v2, %v1312_v59  ;;  %vm993_vm15 = vcmp.eq.f32.partialorder %v2504_v52, 0.0 }
 0x4ee   : > { %1797 = vrsqrt.f32 %v2539_v46  ;;  %v1123_v39 = vmax.f32 %v2566_v10, 1e-08  ;;  %vm1077_vm12 = vcmp.eq.f32.partialorder %v2473_v14, 0.0  ;;  %v1072_v43 = vsel %vm1070_vm1, %v1071_v62, %v1069_v6 }
 0x4ef   : > { %v1076_v49 = vsel %vm1075_vm3, %v2473_v14, %v1074_v47  ;;  %v1078_v40 = vand.u32 2147483648, %v2473_v14  ;;  %vm1252_vm8 = vcmask 720512   ;;  %v1322_v59 = vsel %vm1224_vm9, %v2532_v42, %v1317_v29 }
 0x4f0   : > { %v1792_v22 = vpop.eup %1791  ;;  %v988_v34 = vsel %vm986_vm14, %v987_v12, %v985_v31  ;;  %v1331_v61 = vrot.slane %v1134_v38, %v2261_v15  ;;  %vm1096_vm1 = vcmp.eq.f32.partialorder %v2516_v41, inf  ;;  %vm1098_vm2 = vcmp.eq.f32.partialorder %v2516_v41, 0.0 }
 0x4f1   : > { %v2559_v8 = vpop.xlane.xlu1 %878  ;;  %v1060_v36 = vmul.f32 %v1792_v22, %v2496_v21  ;;  %v1794_v19 = vpop.eup %1793  ;;  %v1136_v0 = vmax.f32 %v1072_v43, 1e-08  ;;  %v1079_v32 = vsel %vm1077_vm12, %v1078_v40, %v1076_v49  ;;  %vm1082_vm9 = vcmp.eq.f32.partialorder %v2539_v46, inf }
 0x4f2   : > { %1799 = vrsqrt.f32 %v2559_v8  ;;  %v1085_v11 = vand.u32 2147483648, %v2539_v46  ;;  %vm1259_vm14 = vcmask 786112   ;;  %vm1084_vm3 = vcmp.eq.f32.partialorder %v2539_v46, 0.0 }
 0x4f3   : > { %v1062_v63 = vsel %vm1061_vm10, %v2496_v21, %v1060_v36  ;;  %v990_v21 = vmul.f32 %v1794_v19, %v2504_v52  ;;  %vm1266_vm10 = vcmask 851712   ;;  %v1099_v1 = vand.u32 2147483648, %v2516_v41 }
 0x4f4   : > { %v1796_v44 = vpop.eup %1795  ;;  %v1065_v37 = vsel %vm1063_vm5, %v1064_v7, %v1062_v63  ;;  %vm1273_vm5 = vcmask 917312   ;;  %v1137_v4 = vmax.f32 %v1079_v32, 1e-08  ;;  %v1341_v47 = vrot.slane %v1136_v0, %v2254_v48 }
 0x4f5   : > { %v2586_v20 = vpop.xlane.xlu1 %882  ;;  %v1135_v58 = vmax.f32 %v1065_v37, 1e-08  ;;  %v1095_v57 = vmul.f32 %v1796_v44, %v2516_v41  ;;  %v992_v15 = vsel %vm991_vm7, %v2504_v52, %v990_v21  ;;  %v1092_v7 = vand.u32 2147483648, %v2559_v8 }
 0x4f6   : > { %1801 = vrsqrt.f32 %v2586_v20  ;;  %v1272_v19 = vrot.slane %v1123_v39, %v2301_v27  ;;  %v1124_v48 = vmax.f32 %v988_v34, 1e-08  ;;  %v1346_v29 = vrot.slane %v1137_v4, %v2268_v55 }
 0x4f7   : > { %v1336_v62 = vrot.slane %v1135_v58, %v2271_v56  ;;  %v1327_v56 = vsel %vm1231_vm4, %v1326_v60, %v1322_v59  ;;  %v1097_v22 = vsel %vm1096_vm1, %v2516_v41, %v1095_v57  ;;  %vm1091_vm4 = vcmp.eq.f32.partialorder %v2559_v8, 0.0 }
 0x4f8   : > { %v1798_v50 = vpop.eup %1797  ;;  %v1332_v14 = vsel %vm1238_vm6, %v1331_v61, %v1327_v56  ;;  %vm1089_vm6 = vcmp.eq.f32.partialorder %v2559_v8, inf  ;;  %v1100_v6 = vsel %vm1098_vm2, %v1099_v1, %v1097_v22  ;;  %v1106_v41 = vand.u32 2147483648, %v2586_v20 }
 0x4f9   : > { %v1081_v54 = vmul.f32 %v1798_v50, %v2539_v46  ;;  %v1337_v24 = vsel %vm1245_vm11, %v1336_v62, %v1332_v14  ;;  %v1140_v39 = vmax.f32 %v1100_v6, 1e-08  ;;  %vm1103_vm11 = vcmp.eq.f32.partialorder %v2586_v20, inf }
 0x4fa   : > { %v1342_v52 = vsel %vm1252_vm8, %v1341_v47, %v1337_v24  ;;  %vm1105_vm7 = vcmp.eq.f32.partialorder %v2586_v20, 0.0  ;;  %v1279_v21 = vrot.slane %v1124_v48, %v2354_v18  ;;  %vm1280_vm13 = vcmask 982912  }
 0x4fb   : > { %v1083_v42 = vsel %vm1082_vm9, %v2539_v46, %v1081_v54  ;;  %v995_v46 = vsel %vm993_vm15, %v994_v5, %v992_v15  ;;  %v1347_v55 = vsel %vm1259_vm14, %v1346_v29, %v1342_v52  ;;  %vm1287_vm15 = vcmask 1048512  }
 0x4fc   : > { %v1800_v12 = vpop.eup %1799  ;;  %v1086_v2 = vsel %vm1084_vm3, %v1085_v11, %v1083_v42  ;;  %v1125_v5 = vmax.f32 %v995_v46, 1e-08  ;;  %v1361_v59 = vrot.slane %v1140_v39, %v2354_v18  ;;  %vm1368_vm12 = vcmask 1041409  }
 0x4fd   : > { %v1138_v10 = vmax.f32 %v1086_v2, 1e-08  ;;  %v1088_v36 = vmul.f32 %v1800_v12, %v2559_v8  ;;  %vm1398_vm1 = vcmask 1024  }
 0x4ff   : > { %v1090_v38 = vsel %vm1089_vm6, %v2559_v8, %v1088_v36  ;;  %v1351_v44 = vrot.slane %v1138_v10, %v2288_v3  ;;  %v1253_v8 = vsel %vm1252_vm8, %v2443_v25, %v2529_v53  ;;  %v1286_v25 = vrot.slane %v1125_v5, %v2304_v30 }
 0x500   : > { %v1802_v63 = vpop.eup %1801  ;;  %v1093_v60 = vsel %vm1091_vm4, %v1092_v7, %v1090_v38  ;;  %v1260_v50 = vsel %vm1259_vm14, %v2482_v17, %v1253_v8  ;;  %v776_v53 = vadd.f32 %v775_v26, %v2167_v45  ;;  %v1146_v17 = vrot.slane %v1109_v23, %v1145_v35 }
 0x501   : > { %v1139_v31 = vmax.f32 %v1093_v60, 1e-08  ;;  %v1102_v37 = vmul.f32 %v1802_v63, %v2586_v20  ;;  %v1352_v49 = vsel %vm1266_vm10, %v1351_v44, %v1347_v55  ;;  %v783_v45 = vadd.f32 %v782_v28, %v2171_v51 }
 0x502   : > { %v777_v62 = vrot.slane %v776_v53, 2  ;;  %vm1392_vm8 = vcmask 1041408  }
 0x503   : > { %v1356_v3 = vrot.slane %v1139_v31, %v2301_v27  ;;  %v1104_v58 = vsel %vm1103_vm11, %v2586_v20, %v1102_v37  ;;  %v1267_v20 = vsel %vm1266_vm10, %v2562_v33, %v1260_v50  ;;  %v784_v54 = vrot.slane %v783_v45, 2 }
 0x504   : > { %v1107_v43 = vsel %vm1105_vm7, %v1106_v41, %v1104_v58  ;;  %v1274_v61 = vsel %vm1273_vm5, %v1272_v19, %v1267_v20  ;;  %v778_v35 = vadd.f32 %v777_v62, %v776_v53 }
 0x505   : > { %v1141_v40 = vmax.f32 %v1107_v43, 1e-08  ;;  %v1357_v27 = vsel %vm1273_vm5, %v1356_v3, %v1352_v49  ;;  %v1281_v26 = vsel %vm1280_vm13, %v1279_v21, %v1274_v61  ;;  %v785_v23 = vadd.f32 %v784_v54, %v783_v45 }
 0x506   : > { %v1362_v33 = vsel %vm1280_vm13, %v1361_v59, %v1357_v27  ;;  %v1288_v57 = vsel %vm1287_vm15, %v1286_v25, %v1281_v26  ;;  %v779_v0 = vrot.slane %v778_v35, 1 }
 0x507   : > { %v1366_v34 = vrot.slane %v1141_v40, %v2304_v30  ;;  %v786_v32 = vrot.slane %v785_v23, 1 }
 0x508   : > { %v780_v11 = vadd.f32 %v779_v0, %v778_v35 }
 0x509   : > { %v1367_v18 = vsel %vm1287_vm15, %v1366_v34, %v1362_v33  ;;  %v787_v28 = vadd.f32 %v786_v32, %v785_v23 }
 0x50a   : > { %v1369_v30 = vsel %vm1368_vm12, %v1367_v18, %v1288_v57 }
 0x50b   : > { %v1371_v16 = vmul.f32 %v1369_v30, %v1146_v17 }
 0x50d   : > { %v1373_v9 = vrot.slane %v1371_v16, 1  ;;  %1803 = vrcp.f32 %v1371_v16 }
 0x50f   : > { %1805 = vrcp.f32 %v1373_v9 }
 0x517   : > { %v1804_v51 = vpop.eup %1803 }
 0x518   : > { %v1377_v15 = vmul.f32 %v1804_v51, %v780_v11 }
 0x519   : > { %v1806_v56 = vpop.eup %1805 }
 0x51a   : > { %v1379_v42 = vmul.f32 %v1806_v56, %v787_v28  ;;  %v1380_v12 = vmul.f32 5.0, %v1377_v15 }
 0x51c   : > { %v1381_v14 = vmul.f32 5.0, %v1379_v42  ;;  %v1382_v22 = vmul.f32 1.442695, %v1380_v12 }
 0x51e   : > { %v1384_v1 = vmul.f32 1.442695, %v1381_v14 }
 0x520   : > { %1807 = vpow2.f32 %v1384_v1 }
 0x521   : > { %1809 = vpow2.f32 %v1382_v22 }
 0x52a   : > { %v1808_v2 = vpop.eup %1807 }
 0x52b   : > { %v1388_v4 = vrot.slane %v1808_v2, 7  ;;  %v1810_v24 = vpop.eup %1809 }
 0x52d   : > { %v1389_v10 = vsel %vm1368_vm12, %v1388_v4, %v1810_v24 }
 0x52e   : > { %v1391_v36 = vsel %vm2141_vm0, %v1389_v10, 0.0 }
 0x52f   : > { %v1393_v47 = vsel %vm1392_vm8, %v1391_v36, 0.0 }
 0x530   : > { %1394 = vadd.xlane.f32.xlu0 %v1393_v47 }
 0x5bd   : > { %v1395_v46 = vpop.xlane.xlu0 %1394 }
 0x5be   : > { %1811 = vlog2.f32 %v1395_v46 }
 0x5c8   : > { %v1812_v7 = vpop.eup %1811 }
 0x5c9   : > { %v1397_v19 = vmul.f32 0.6931472, %v1812_v7 }
 0x5cb   : > { %1399 = vst.msk [vmem:[%s252_s17] sm:$0x3] %vm1398_vm1, %v1397_v19 }
 0x5cc PF: > { %s22_s30 = sadd.s32 1, %s1937_s30   ;;  %s2722_s25 = smov %s1921_s26 }
 0x5cd   : > { %p19_p4 = scmp.ge.s32.totalorder %s22_s30, 4   ;;  %s2723_s26 = smov %s1925_s27 }
 0x5ce   : > { %s2724_s27 = smov %s2067_s12  ;;  %s2725_s28 = smov %s1933_s29 }
 0x5cf   : > { %s2726_s29 = smov %s2728_s11  ;;  %21 = sbr.rel (!%p19_p4) target bundleno = 17 (0x11), region = 80 }
 0x5d6   :  { %1425 = vsyncpa [#allocation5], 1 }
 0x5d7   :  { %1427 = vsyncpa [#allocation5 + $0x1], 1 }
 0x5d8   :  { %1428 = vsyncpa [#allocation7], 1 }

</bundles_post_ra>
